<compile_context>
chip_gen: v7x
topology: tpu7x:2x2x1
jax: 0.10.0
libtpu: 0.0.40
codegen_flags: <defaults>
</compile_context>

<pallas_src>
import math

import jax
import jax.numpy as jnp
import numpy as np
from jax import lax
from jax.experimental import pallas as pl
from jax.experimental.pallas import tpu as pltpu

# ---- model hyper-parameters (small, consistent with the module) ------------
B = 2          # batch
S = 8          # sequence length
E = 32         # input_dim
N_HEAD = 4     # n_head
HEAD_DIM = E // N_HEAD
FF = 64        # ff_dim
LN_EPS = 1e-5  # PyTorch LayerNorm default
NEG = -1e9     # additive mask value (exp underflows to exactly 0 in f32)

W_COLS = 4 * E + 2 * FF          # 256: [wqkv(3E) | wo(E) | w1(FF) | w2^T(FF)]
HI = lax.Precision.HIGHEST


# ------------------------------ kernel --------------------------------------
def encoder_kernel(x_ref, mask_ref, w_ref, vec_ref, out_ref):
    x = x_ref[...]                      # (T, E), T = B*S
    mask = mask_ref[...]                # (H*T, T) combined additive mask, pre-tiled per head
    T = x.shape[0]

    # -- static slices out of the packed slabs --------------------------------
    wqkv = w_ref[:, 0:3 * E]                         # (E, 3E)  (1/sqrt(d) folded into Q cols)
    wo   = w_ref[:, 3 * E:4 * E]                     # (E, E)
    w1   = w_ref[:, 4 * E:4 * E + FF]                # (E, FF)
    w2t  = w_ref[:, 4 * E + FF:4 * E + 2 * FF]       # (E, FF)  == W2^T

    bqkv = vec_ref[0:1, 0:3 * E]                     # (1, 3E)
    b1   = vec_ref[1:2, 0:FF]                        # (1, FF)
    g1   = vec_ref[2:3, 0:E]
    be1  = vec_ref[3:4, 0:E]
    g2   = vec_ref[4:5, 0:E]
    be2  = vec_ref[5:6, 0:E]
    bo   = vec_ref[6:7, 0:E]
    b2   = vec_ref[7:8, 0:E]

    # ---- fused QKV projection (one MXU matmul, N = 3E) ----------------------
    qkv = jnp.dot(x, wqkv, preferred_element_type=jnp.float32, precision=HI) + bqkv

    # ---- per-head scores, stacked to one (H*T, T) slab -----------------------
    s_blocks = []
    for h in range(N_HEAD):
        lo = h * HEAD_DIM
        qh = qkv[:, lo:lo + HEAD_DIM]                          # scale pre-folded
        kh = qkv[:, E + lo:E + lo + HEAD_DIM]
        s_blocks.append(lax.dot_general(qh, kh, (((1,), (1,)), ((), ())),
                                        preferred_element_type=jnp.float32,
                                        precision=HI))
    s_all = jnp.concatenate(s_blocks, axis=0) + mask           # (H*T, T)

    # ---- ONE softmax pass over all heads -------------------------------------
    m = jnp.max(s_all, axis=-1, keepdims=True)
    p = jnp.exp(s_all - m)
    denom = jnp.sum(p, axis=-1, keepdims=True)
    r = pl.reciprocal(denom, approx=True)
    r = r * (2.0 - denom * r)              # one Newton-Raphson step (~1e-7 rel.)
    p = p * r

    # ---- per-head P.V, assemble ctx, single W_o matmul ------------------------
    ctx_blocks = []
    for h in range(N_HEAD):
        lo = h * HEAD_DIM
        vh = qkv[:, 2 * E + lo:2 * E + lo + HEAD_DIM]
        ph = p[h * T:(h + 1) * T, :]
        ctx_blocks.append(jnp.dot(ph, vh, preferred_element_type=jnp.float32,
                                  precision=HI))
    ctx = jnp.concatenate(ctx_blocks, axis=1)                   # (T, E)
    attn = jnp.dot(ctx, wo, preferred_element_type=jnp.float32, precision=HI) + bo

    # ---- residual + LayerNorm 1 ----------------------------------------------
    src = x + attn
    mu = jnp.mean(src, axis=-1, keepdims=True)
    var = jnp.mean((src - mu) * (src - mu), axis=-1, keepdims=True)
    src = (src - mu) * lax.rsqrt(var + LN_EPS) * g1 + be1

    # ---- feed-forward (relu); ff_dropout is identity in eval mode ------------
    h1 = jnp.dot(src, w1, preferred_element_type=jnp.float32, precision=HI) + b1
    h1 = jnp.maximum(h1, 0.0)
    ff = lax.dot_general(h1, w2t, (((1,), (1,)), ((), ())),
                         preferred_element_type=jnp.float32, precision=HI) + b2

    # ---- residual + LayerNorm 2 -----------------------------------------------
    src = src + ff
    mu = jnp.mean(src, axis=-1, keepdims=True)
    var = jnp.mean((src - mu) * (src - mu), axis=-1, keepdims=True)
    out_ref[...] = (src - mu) * lax.rsqrt(var + LN_EPS) * g2 + be2


# ------------------------------ packing (one-time) ---------------------------
def pack_params(params):
    """Pack all weights into one (E, 256) slab and all vectors into one (8, 256) slab."""
    (wq, bq, wk, bk, wv, bv, wo, bo,
     g1, be1, w1, b1, w2, b2, g2, be2) = params
    scale = 1.0 / math.sqrt(HEAD_DIM)

    wqkv = jnp.concatenate([wq * scale, wk, wv], axis=1)            # (E, 3E)
    w_slab = jnp.concatenate([wqkv, wo, w1, w2.T], axis=1)          # (E, 4E+2FF)

    bqkv = jnp.concatenate([bq * scale, bk, bv], axis=1)            # (1, 3E)
    vec_slab = jnp.zeros((8, W_COLS), jnp.float32)
    vec_slab = vec_slab.at[0, 0:3 * E].set(bqkv[0])
    vec_slab = vec_slab.at[1, 0:FF].set(b1[0])
    vec_slab = vec_slab.at[2, 0:E].set(g1[0])
    vec_slab = vec_slab.at[3, 0:E].set(be1[0])
    vec_slab = vec_slab.at[4, 0:E].set(g2[0])
    vec_slab = vec_slab.at[5, 0:E].set(be2[0])
    vec_slab = vec_slab.at[6, 0:E].set(bo[0])
    vec_slab = vec_slab.at[7, 0:E].set(b2[0])
    return w_slab, vec_slab


def build_mask(future_mask, pad_add):
    """Combined additive mask over flattened tokens, pre-tiled per head: (H*B*S, B*S)."""
    b_ids = jnp.repeat(jnp.arange(B), S)
    same = b_ids[:, None] == b_ids[None, :]
    big = jnp.where(same,
                    jnp.tile(future_mask, (B, B)) + pad_add.reshape(-1)[None, :],
                    NEG).astype(jnp.float32)                       # (B*S, B*S)
    return jnp.tile(big, (N_HEAD, 1))                              # (H*B*S, B*S)


# ------------------------------ wrapper ---------------------------------------
@jax.jit
def multivar_transformer_encoder(x, mask_hts, w_slab, vec_slab):
    """x: (B,S,E) f32; mask_hts: (H*B*S, B*S) additive f32; slabs from pack_params."""
    Bv, Sv, Ev = x.shape
    x2d = x.reshape(Bv * Sv, Ev)
    vmem = pltpu.MemorySpace.VMEM
    out2d = pl.pallas_call(
        encoder_kernel,
        out_shape=jax.ShapeDtypeStruct((Bv * Sv, Ev), jnp.float32),
        in_specs=[pl.BlockSpec(memory_space=vmem)] * 4,
        out_specs=pl.BlockSpec(memory_space=vmem),
    )(x2d, mask_hts, w_slab, vec_slab)
    return out2d.reshape(Bv, Sv, Ev)


# ---------------- pure-JAX reference (mirrors nn.MultiheadAttention) ----------
def reference(x, future_mask, pad_add, params):
    (wq, bq, wk, bk, wv, bv, wo, bo,
     g1, be1, w1, b1, w2, b2, g2, be2) = params
    mm = lambda a, b: jnp.matmul(a, b, precision=HI)
    q = mm(x, wq) + bq
    k = mm(x, wk) + bk
    v = mm(x, wv) + bv
    qh = q.reshape(B, S, N_HEAD, HEAD_DIM).transpose(0, 2, 1, 3)
    kh = k.reshape(B, S, N_HEAD, HEAD_DIM).transpose(0, 2, 1, 3)
    vh = v.reshape(B, S, N_HEAD, HEAD_DIM).transpose(0, 2, 1, 3)
    s = jnp.einsum('bhqd,bhkd->bhqk', qh, kh, precision=HI) / math.sqrt(HEAD_DIM)
    s = s + future_mask[None, None] + pad_add[:, None, None, :]
    p = jax.nn.softmax(s, axis=-1)
    ctx = jnp.einsum('bhqk,bhkd->bhqd', p, vh, precision=HI)
    ctx = ctx.transpose(0, 2, 1, 3).reshape(B, S, E)
    attn = mm(ctx, wo) + bo

    def ln(z, g, bta):
        mu = jnp.mean(z, axis=-1, keepdims=True)
        var = jnp.mean((z - mu) ** 2, axis=-1, keepdims=True)
        return (z - mu) / jnp.sqrt(var + LN_EPS) * g + bta

    src = ln(x + attn, g1, be1)
    ff = mm(jnp.maximum(mm(src, w1) + b1, 0.0), w2) + b2
    return ln(src + ff, g2, be2)


if __name__ == "__main__":
    key = jax.random.PRNGKey(0)
    ks = jax.random.split(key, 16)

    def w(k, shape, fan_in):
        return jax.random.normal(k, shape, jnp.float32) / math.sqrt(fan_in)

    # weights are stored pre-transposed: (in, out), so the kernel does x @ W + b
    wq = w(ks[0], (E, E), E); bq = w(ks[1], (1, E), E)
    wk = w(ks[2], (E, E), E); bk = w(ks[3], (1, E), E)
    wv = w(ks[4], (E, E), E); bv = w(ks[5], (1, E), E)
    wo = w(ks[6], (E, E), E); bo = w(ks[7], (1, E), E)
    g1 = jnp.ones((1, E), jnp.float32); be1 = jnp.zeros((1, E), jnp.float32)
    w1 = w(ks[8], (E, FF), E);  b1 = w(ks[9], (1, FF), E)
    w2 = w(ks[10], (FF, E), FF); b2 = w(ks[11], (1, E), FF)
    g2 = jnp.ones((1, E), jnp.float32); be2 = jnp.zeros((1, E), jnp.float32)
    params = (wq, bq, wk, bk, wv, bv, wo, bo,
              g1, be1, w1, b1, w2, b2, g2, be2)

    # inputs
    x = jax.random.normal(ks[12], (B, S, E), jnp.float32)

    # causal future mask (additive): 0 on/below diagonal, -1e9 above
    causal = jnp.triu(jnp.ones((S, S), jnp.float32), k=1) * NEG

    # key padding mask: batch 1 has its last position padded (True -> masked)
    pad_bool = jnp.zeros((B, S), bool).at[1, S - 1].set(True)
    pad_add = jnp.where(pad_bool, NEG, 0.0).astype(jnp.float32)

    # one-time packing (weights + vectors + per-head tiled mask)
    w_slab, vec_slab = pack_params(params)
    mask_hts = build_mask(causal, pad_add)

    out = multivar_transformer_encoder(x, mask_hts, w_slab, vec_slab)
    jax.block_until_ready(out)

    ref = reference(x, causal, pad_add, params)
    np.testing.assert_allclose(np.asarray(out), np.asarray(ref),
                               rtol=1e-4, atol=1e-4)

    print("KERNEL_OK")
</pallas_src>

<mosaic_0001>
module attributes {stable_mosaic.version = 11 : i64} {
  func.func @encoder_kernel(%arg0: memref<16x32xf32, #tpu.memory_space<vmem>>, %arg1: memref<64x16xf32, #tpu.memory_space<vmem>>, %arg2: memref<32x256xf32, #tpu.memory_space<vmem>>, %arg3: memref<8x256xf32, #tpu.memory_space<vmem>>, %arg4: memref<16x32xf32, #tpu.memory_space<vmem>>) attributes {dimension_semantics = [], scalar_prefetch = 0 : i64, scratch_operands = 0 : i64, tpu.core_type = #tpu.core_type<tc>} {
    %c0 = arith.constant 0 : index
    %c0_0 = arith.constant 0 : index
    %0 = vector.load %arg0[%c0, %c0_0] : memref<16x32xf32, #tpu.memory_space<vmem>>, vector<16x32xf32>
    %c0_1 = arith.constant 0 : index
    %c0_2 = arith.constant 0 : index
    %1 = vector.load %arg1[%c0_1, %c0_2] : memref<64x16xf32, #tpu.memory_space<vmem>>, vector<64x16xf32>
    %c0_3 = arith.constant 0 : index
    %c0_4 = arith.constant 0 : index
    %2 = vector.load %arg2[%c0_3, %c0_4] : memref<32x256xf32, #tpu.memory_space<vmem>>, vector<32x96xf32>
    %c0_5 = arith.constant 0 : index
    %c96 = arith.constant 96 : index
    %3 = vector.load %arg2[%c0_5, %c96] : memref<32x256xf32, #tpu.memory_space<vmem>>, vector<32x32xf32>
    %c0_6 = arith.constant 0 : index
    %c128 = arith.constant 128 : index
    %4 = vector.load %arg2[%c0_6, %c128] : memref<32x256xf32, #tpu.memory_space<vmem>>, vector<32x64xf32>
    %c0_7 = arith.constant 0 : index
    %c192 = arith.constant 192 : index
    %5 = vector.load %arg2[%c0_7, %c192] : memref<32x256xf32, #tpu.memory_space<vmem>>, vector<32x64xf32>
    %c0_8 = arith.constant 0 : index
    %c0_9 = arith.constant 0 : index
    %6 = vector.load %arg3[%c0_8, %c0_9] : memref<8x256xf32, #tpu.memory_space<vmem>>, vector<1x96xf32>
    %c1 = arith.constant 1 : index
    %c0_10 = arith.constant 0 : index
    %7 = vector.load %arg3[%c1, %c0_10] : memref<8x256xf32, #tpu.memory_space<vmem>>, vector<1x64xf32>
    %c2 = arith.constant 2 : index
    %c0_11 = arith.constant 0 : index
    %8 = vector.load %arg3[%c2, %c0_11] : memref<8x256xf32, #tpu.memory_space<vmem>>, vector<1x32xf32>
    %c3 = arith.constant 3 : index
    %c0_12 = arith.constant 0 : index
    %9 = vector.load %arg3[%c3, %c0_12] : memref<8x256xf32, #tpu.memory_space<vmem>>, vector<1x32xf32>
    %c4 = arith.constant 4 : index
    %c0_13 = arith.constant 0 : index
    %10 = vector.load %arg3[%c4, %c0_13] : memref<8x256xf32, #tpu.memory_space<vmem>>, vector<1x32xf32>
    %c5 = arith.constant 5 : index
    %c0_14 = arith.constant 0 : index
    %11 = vector.load %arg3[%c5, %c0_14] : memref<8x256xf32, #tpu.memory_space<vmem>>, vector<1x32xf32>
    %c6 = arith.constant 6 : index
    %c0_15 = arith.constant 0 : index
    %12 = vector.load %arg3[%c6, %c0_15] : memref<8x256xf32, #tpu.memory_space<vmem>>, vector<1x32xf32>
    %c7 = arith.constant 7 : index
    %c0_16 = arith.constant 0 : index
    %13 = vector.load %arg3[%c7, %c0_16] : memref<8x256xf32, #tpu.memory_space<vmem>>, vector<1x32xf32>
    %cst = arith.constant dense<0.000000e+00> : vector<16x96xf32>
    %14 = tpu.matmul %0, %2, %cst {dimension_numbers = #tpu.dot_dimension_numbers<[1], [0], [0], [1], [0, 0, 1, 1], [], []>, precision = #tpu.contract_precision<fp32>} : vector<16x32xf32>, vector<32x96xf32>, vector<16x96xf32> -> vector<16x96xf32>
    %15 = vector.broadcast %6 : vector<1x96xf32> to vector<16x96xf32>
    %16 = arith.addf %14, %15 : vector<16x96xf32>
    %17 = vector.extract_strided_slice %16 {offsets = [0, 0], sizes = [16, 8], strides = [1, 1]} : vector<16x96xf32> to vector<16x8xf32>
    %18 = vector.extract_strided_slice %16 {offsets = [0, 32], sizes = [16, 8], strides = [1, 1]} : vector<16x96xf32> to vector<16x8xf32>
    %cst_17 = arith.constant dense<0.000000e+00> : vector<16x16xf32>
    %19 = tpu.matmul %17, %18, %cst_17 {dimension_numbers = #tpu.dot_dimension_numbers<[1], [1], [0], [0], [0, 0, 1, 0], [], []>, precision = #tpu.contract_precision<fp32>} : vector<16x8xf32>, vector<16x8xf32>, vector<16x16xf32> -> vector<16x16xf32>
    %20 = vector.extract_strided_slice %16 {offsets = [0, 8], sizes = [16, 8], strides = [1, 1]} : vector<16x96xf32> to vector<16x8xf32>
    %21 = vector.extract_strided_slice %16 {offsets = [0, 40], sizes = [16, 8], strides = [1, 1]} : vector<16x96xf32> to vector<16x8xf32>
    %cst_18 = arith.constant dense<0.000000e+00> : vector<16x16xf32>
    %22 = tpu.matmul %20, %21, %cst_18 {dimension_numbers = #tpu.dot_dimension_numbers<[1], [1], [0], [0], [0, 0, 1, 0], [], []>, precision = #tpu.contract_precision<fp32>} : vector<16x8xf32>, vector<16x8xf32>, vector<16x16xf32> -> vector<16x16xf32>
    %23 = vector.extract_strided_slice %16 {offsets = [0, 16], sizes = [16, 8], strides = [1, 1]} : vector<16x96xf32> to vector<16x8xf32>
    %24 = vector.extract_strided_slice %16 {offsets = [0, 48], sizes = [16, 8], strides = [1, 1]} : vector<16x96xf32> to vector<16x8xf32>
    %cst_19 = arith.constant dense<0.000000e+00> : vector<16x16xf32>
    %25 = tpu.matmul %23, %24, %cst_19 {dimension_numbers = #tpu.dot_dimension_numbers<[1], [1], [0], [0], [0, 0, 1, 0], [], []>, precision = #tpu.contract_precision<fp32>} : vector<16x8xf32>, vector<16x8xf32>, vector<16x16xf32> -> vector<16x16xf32>
    %26 = vector.extract_strided_slice %16 {offsets = [0, 24], sizes = [16, 8], strides = [1, 1]} : vector<16x96xf32> to vector<16x8xf32>
    %27 = vector.extract_strided_slice %16 {offsets = [0, 56], sizes = [16, 8], strides = [1, 1]} : vector<16x96xf32> to vector<16x8xf32>
    %cst_20 = arith.constant dense<0.000000e+00> : vector<16x16xf32>
    %28 = tpu.matmul %26, %27, %cst_20 {dimension_numbers = #tpu.dot_dimension_numbers<[1], [1], [0], [0], [0, 0, 1, 0], [], []>, precision = #tpu.contract_precision<fp32>} : vector<16x8xf32>, vector<16x8xf32>, vector<16x16xf32> -> vector<16x16xf32>
    %29 = tpu.concatenate %19, %22, %25, %28 in 0 : vector<16x16xf32>, vector<16x16xf32>, vector<16x16xf32>, vector<16x16xf32> -> vector<64x16xf32>
    %30 = arith.addf %29, %1 : vector<64x16xf32>
    %cst_21 = arith.constant dense<0xFF800000> : vector<64xf32>
    %31 = vector.multi_reduction <maximumf>, %30, %cst_21 [1] : vector<64x16xf32> to vector<64xf32>
    %32 = vector.shape_cast %31 : vector<64xf32> to vector<64x1xf32>
    %33 = vector.broadcast %32 : vector<64x1xf32> to vector<64x16xf32>
    %34 = arith.subf %30, %33 : vector<64x16xf32>
    %35 = math.exp %34 : vector<64x16xf32>
    %cst_22 = arith.constant dense<0.000000e+00> : vector<64xf32>
    %36 = vector.multi_reduction <add>, %35, %cst_22 [1] : vector<64x16xf32> to vector<64xf32>
    %37 = vector.shape_cast %36 : vector<64xf32> to vector<64x1xf32>
    %38 = tpu.reciprocal %37 {approx = true} : vector<64x1xf32> -> vector<64x1xf32>
    %39 = arith.mulf %37, %38 : vector<64x1xf32>
    %cst_23 = arith.constant 2.000000e+00 : f32
    %40 = vector.broadcast %cst_23 : f32 to vector<64x1xf32>
    %41 = arith.subf %40, %39 : vector<64x1xf32>
    %42 = arith.mulf %38, %41 : vector<64x1xf32>
    %43 = vector.broadcast %42 : vector<64x1xf32> to vector<64x16xf32>
    %44 = arith.mulf %35, %43 : vector<64x16xf32>
    %45 = vector.extract_strided_slice %16 {offsets = [0, 64], sizes = [16, 8], strides = [1, 1]} : vector<16x96xf32> to vector<16x8xf32>
    %46 = vector.extract_strided_slice %44 {offsets = [0, 0], sizes = [16, 16], strides = [1, 1]} : vector<64x16xf32> to vector<16x16xf32>
    %cst_24 = arith.constant dense<0.000000e+00> : vector<16x8xf32>
    %47 = tpu.matmul %46, %45, %cst_24 {dimension_numbers = #tpu.dot_dimension_numbers<[1], [0], [0], [1], [0, 0, 1, 1], [], []>, precision = #tpu.contract_precision<fp32>} : vector<16x16xf32>, vector<16x8xf32>, vector<16x8xf32> -> vector<16x8xf32>
    %48 = vector.extract_strided_slice %16 {offsets = [0, 72], sizes = [16, 8], strides = [1, 1]} : vector<16x96xf32> to vector<16x8xf32>
    %49 = vector.extract_strided_slice %44 {offsets = [16, 0], sizes = [16, 16], strides = [1, 1]} : vector<64x16xf32> to vector<16x16xf32>
    %cst_25 = arith.constant dense<0.000000e+00> : vector<16x8xf32>
    %50 = tpu.matmul %49, %48, %cst_25 {dimension_numbers = #tpu.dot_dimension_numbers<[1], [0], [0], [1], [0, 0, 1, 1], [], []>, precision = #tpu.contract_precision<fp32>} : vector<16x16xf32>, vector<16x8xf32>, vector<16x8xf32> -> vector<16x8xf32>
    %51 = vector.extract_strided_slice %16 {offsets = [0, 80], sizes = [16, 8], strides = [1, 1]} : vector<16x96xf32> to vector<16x8xf32>
    %52 = vector.extract_strided_slice %44 {offsets = [32, 0], sizes = [16, 16], strides = [1, 1]} : vector<64x16xf32> to vector<16x16xf32>
    %cst_26 = arith.constant dense<0.000000e+00> : vector<16x8xf32>
    %53 = tpu.matmul %52, %51, %cst_26 {dimension_numbers = #tpu.dot_dimension_numbers<[1], [0], [0], [1], [0, 0, 1, 1], [], []>, precision = #tpu.contract_precision<fp32>} : vector<16x16xf32>, vector<16x8xf32>, vector<16x8xf32> -> vector<16x8xf32>
    %54 = vector.extract_strided_slice %16 {offsets = [0, 88], sizes = [16, 8], strides = [1, 1]} : vector<16x96xf32> to vector<16x8xf32>
    %55 = vector.extract_strided_slice %44 {offsets = [48, 0], sizes = [16, 16], strides = [1, 1]} : vector<64x16xf32> to vector<16x16xf32>
    %cst_27 = arith.constant dense<0.000000e+00> : vector<16x8xf32>
    %56 = tpu.matmul %55, %54, %cst_27 {dimension_numbers = #tpu.dot_dimension_numbers<[1], [0], [0], [1], [0, 0, 1, 1], [], []>, precision = #tpu.contract_precision<fp32>} : vector<16x16xf32>, vector<16x8xf32>, vector<16x8xf32> -> vector<16x8xf32>
    %57 = tpu.concatenate %47, %50, %53, %56 in 1 : vector<16x8xf32>, vector<16x8xf32>, vector<16x8xf32>, vector<16x8xf32> -> vector<16x32xf32>
    %cst_28 = arith.constant dense<0.000000e+00> : vector<16x32xf32>
    %58 = tpu.matmul %57, %3, %cst_28 {dimension_numbers = #tpu.dot_dimension_numbers<[1], [0], [0], [1], [0, 0, 1, 1], [], []>, precision = #tpu.contract_precision<fp32>} : vector<16x32xf32>, vector<32x32xf32>, vector<16x32xf32> -> vector<16x32xf32>
    %59 = vector.broadcast %12 : vector<1x32xf32> to vector<16x32xf32>
    %60 = arith.addf %58, %59 : vector<16x32xf32>
    %61 = arith.addf %0, %60 : vector<16x32xf32>
    %cst_29 = arith.constant dense<0.000000e+00> : vector<16xf32>
    %62 = vector.multi_reduction <add>, %61, %cst_29 [1] : vector<16x32xf32> to vector<16xf32>
    %63 = vector.shape_cast %62 : vector<16xf32> to vector<16x1xf32>
    %cst_30 = arith.constant 3.200000e+01 : f32
    %64 = vector.broadcast %cst_30 : f32 to vector<16x1xf32>
    %65 = arith.divf %63, %64 : vector<16x1xf32>
    %66 = vector.broadcast %65 : vector<16x1xf32> to vector<16x32xf32>
    %67 = arith.subf %61, %66 : vector<16x32xf32>
    %68 = vector.broadcast %65 : vector<16x1xf32> to vector<16x32xf32>
    %69 = arith.subf %61, %68 : vector<16x32xf32>
    %70 = arith.mulf %67, %69 : vector<16x32xf32>
    %cst_31 = arith.constant dense<0.000000e+00> : vector<16xf32>
    %71 = vector.multi_reduction <add>, %70, %cst_31 [1] : vector<16x32xf32> to vector<16xf32>
    %72 = vector.shape_cast %71 : vector<16xf32> to vector<16x1xf32>
    %cst_32 = arith.constant 3.200000e+01 : f32
    %73 = vector.broadcast %cst_32 : f32 to vector<16x1xf32>
    %74 = arith.divf %72, %73 : vector<16x1xf32>
    %75 = vector.broadcast %65 : vector<16x1xf32> to vector<16x32xf32>
    %76 = arith.subf %61, %75 : vector<16x32xf32>
    %cst_33 = arith.constant 9.99999974E-6 : f32
    %77 = vector.broadcast %cst_33 : f32 to vector<16x1xf32>
    %78 = arith.addf %74, %77 : vector<16x1xf32>
    %79 = math.rsqrt %78 : vector<16x1xf32>
    %80 = vector.broadcast %79 : vector<16x1xf32> to vector<16x32xf32>
    %81 = arith.mulf %76, %80 : vector<16x32xf32>
    %82 = vector.broadcast %8 : vector<1x32xf32> to vector<16x32xf32>
    %83 = arith.mulf %81, %82 : vector<16x32xf32>
    %84 = vector.broadcast %9 : vector<1x32xf32> to vector<16x32xf32>
    %85 = arith.addf %83, %84 : vector<16x32xf32>
    %cst_34 = arith.constant dense<0.000000e+00> : vector<16x64xf32>
    %86 = tpu.matmul %85, %4, %cst_34 {dimension_numbers = #tpu.dot_dimension_numbers<[1], [0], [0], [1], [0, 0, 1, 1], [], []>, precision = #tpu.contract_precision<fp32>} : vector<16x32xf32>, vector<32x64xf32>, vector<16x64xf32> -> vector<16x64xf32>
    %87 = vector.broadcast %7 : vector<1x64xf32> to vector<16x64xf32>
    %88 = arith.addf %86, %87 : vector<16x64xf32>
    %cst_35 = arith.constant 0.000000e+00 : f32
    %89 = vector.broadcast %cst_35 : f32 to vector<16x64xf32>
    %90 = arith.maximumf %88, %89 : vector<16x64xf32>
    %cst_36 = arith.constant dense<0.000000e+00> : vector<16x32xf32>
    %91 = tpu.matmul %90, %5, %cst_36 {dimension_numbers = #tpu.dot_dimension_numbers<[1], [1], [0], [0], [0, 0, 1, 0], [], []>, precision = #tpu.contract_precision<fp32>} : vector<16x64xf32>, vector<32x64xf32>, vector<16x32xf32> -> vector<16x32xf32>
    %92 = vector.broadcast %13 : vector<1x32xf32> to vector<16x32xf32>
    %93 = arith.addf %91, %92 : vector<16x32xf32>
    %94 = arith.addf %85, %93 : vector<16x32xf32>
    %cst_37 = arith.constant dense<0.000000e+00> : vector<16xf32>
    %95 = vector.multi_reduction <add>, %94, %cst_37 [1] : vector<16x32xf32> to vector<16xf32>
    %96 = vector.shape_cast %95 : vector<16xf32> to vector<16x1xf32>
    %cst_38 = arith.constant 3.200000e+01 : f32
    %97 = vector.broadcast %cst_38 : f32 to vector<16x1xf32>
    %98 = arith.divf %96, %97 : vector<16x1xf32>
    %99 = vector.broadcast %98 : vector<16x1xf32> to vector<16x32xf32>
    %100 = arith.subf %94, %99 : vector<16x32xf32>
    %101 = vector.broadcast %98 : vector<16x1xf32> to vector<16x32xf32>
    %102 = arith.subf %94, %101 : vector<16x32xf32>
    %103 = arith.mulf %100, %102 : vector<16x32xf32>
    %cst_39 = arith.constant dense<0.000000e+00> : vector<16xf32>
    %104 = vector.multi_reduction <add>, %103, %cst_39 [1] : vector<16x32xf32> to vector<16xf32>
    %105 = vector.shape_cast %104 : vector<16xf32> to vector<16x1xf32>
    %cst_40 = arith.constant 3.200000e+01 : f32
    %106 = vector.broadcast %cst_40 : f32 to vector<16x1xf32>
    %107 = arith.divf %105, %106 : vector<16x1xf32>
    %108 = vector.broadcast %98 : vector<16x1xf32> to vector<16x32xf32>
    %109 = arith.subf %94, %108 : vector<16x32xf32>
    %cst_41 = arith.constant 9.99999974E-6 : f32
    %110 = vector.broadcast %cst_41 : f32 to vector<16x1xf32>
    %111 = arith.addf %107, %110 : vector<16x1xf32>
    %112 = math.rsqrt %111 : vector<16x1xf32>
    %113 = vector.broadcast %112 : vector<16x1xf32> to vector<16x32xf32>
    %114 = arith.mulf %109, %113 : vector<16x32xf32>
    %115 = vector.broadcast %10 : vector<1x32xf32> to vector<16x32xf32>
    %116 = arith.mulf %114, %115 : vector<16x32xf32>
    %117 = vector.broadcast %11 : vector<1x32xf32> to vector<16x32xf32>
    %118 = arith.addf %116, %117 : vector<16x32xf32>
    %c0_42 = arith.constant 0 : index
    %c0_43 = arith.constant 0 : index
    %119 = vector.load %arg4[%c0_42, %c0_43] : memref<16x32xf32, #tpu.memory_space<vmem>>, vector<16x32xf32>
    tpu.vector_store %arg4[%c0_42, %c0_43], %118 {strides = array<i32>} : memref<16x32xf32, #tpu.memory_space<vmem>>, vector<16x32xf32>,
    return
  }
}

</mosaic_0001>

<bundles_post_ra>
// kernel: multivar_transformer_encoder.1
= control target key start
LH: loop header
LB: loop body
LE: loop exit
PB: predicated region body
PF: predicated region fallthrough
CT: control target
= control target key end

     0   :  { %9 = vsyncpa [#allocation3], 0  ;;  %s8886_s0 = inlined_call_operand.vmem [shape: f32[16,32], index: 0, kind: input, shape index: {}]   ;;  %s8887_s1 = inlined_call_operand.vmem [shape: f32[64,16], index: 1, kind: input, shape index: {}]   ;;  %s8888_s2 = inlined_call_operand.vmem [shape: f32[32,256], index: 2, kind: input, shape index: {}]   ;;  %s8889_s3 = inlined_call_operand.hbm [shape: f32[8,256], index: 3, kind: input, shape index: {}]   ;;  %s8890_s4 = inlined_call_operand.hbm [shape: f32[16,32], index: 4, kind: output, shape index: {}]  }
   0x1   :  { %10 = vsyncpa [#allocation4], 0  ;;  %s8155_s15 = smov [#allocation2]   ;;  %s8107_s19 = scalar_lea.hbm %s8889_s3, 256 }
   0x2   :  { %s23_s16 = sshll.u32 %s8155_s15, 4  ;;  %p8108_p0 = scmp.ne.s32.totalorder %s8889_s3, %s8107_s19  ;;  %s24_s16 = int_to_ptr.vmem [resolvable:$true] %s23_s16 }
   0x3   :  { %p8111_p1 = scmp.lt.u32.totalorder %s8107_s19, %s8889_s3 }
   0x5   :  { %p8113_p2 = pnand %p8111_p1, %p8108_p0 }
   0x7   :  { %8116 = shalt.err (!%p8113_p2)
}
   0x8   :  { %s8117_s24 = scalar_lea.vmem %s24_s16, 256  ;;  %p8122_p4 = scmp.lt.s32.totalorder %s24_s16, %s24_s16 }
   0x9   :  { %p8118_p3 = scmp.ne.s32.totalorder %s24_s16, %s8117_s24  ;;  %p8123_p5 = scmp.lt.s32.totalorder %s8117_s24, %s8117_s24 }
   0xb   :  { %p8124_p6 = por %p8123_p5, %p8122_p4 }
   0xd   :  { %p8125_p7 = pnand %p8124_p6, %p8118_p3 }
   0xf   :  { %8128 = shalt.err (!%p8125_p7)
}
  0x10   :  { %26 = dma.hbm_to_vmem [thread:$0]  %s8889_s3, 256, %s24_s16, [#allocation3]  }
  0x11   :  { %8151 = dma.done.wait [#allocation3], 256  }
  0x12   :  { %8152 = vsyncadd [#allocation3], 4294967040  ;;  %vm56_vm0 = vcmask 261120   ;;  %v40_v0 = vld [vmem:[%s8888_s2] sm:$0xff]  ;;  %v41_v1 = vld [vmem:[%s8888_s2 + $0x10] sm:$0xff]  ;;  %vm597_vm1 = vcmask 64512  }
  0x13   :  { %v42_v2 = vld [vmem:[%s8888_s2 + $0x20] sm:$0xff]  ;;  %v64_v3 = vand.u32 4294901760, %v40_v0  ;;  %v67_v4 = vand.u32 4294901760, %v41_v1  ;;  %v43_v5 = vld [vmem:[%s8888_s2 + $0x30] sm:$0xff]  ;;  %v31_v8 = vld [vmem:[%s8886_s0 + $0x8] sm:$0xff]  ;;  %s8156_s12 = smov 88  }
  0x14   :  { %v70_v6 = vand.u32 4294901760, %v42_v2  ;;  %v30_v7 = vld [vmem:[%s8886_s0] sm:$0xff]  ;;  %v73_v9 = vand.u32 4294901760, %v43_v5  ;;  %v61_v11 = vsel %vm56_vm0, %v31_v8, 0  ;;  %s8157_s13 = smov 96   ;;  %s8158_s14 = smov 120  }
  0x15   :  { %v58_v10 = vsel %vm56_vm0, %v30_v7, 0  ;;  %v8230_v12 = vpack.c.bf16 %v67_v4, %v64_v3  ;;  %v8234_v14 = vand.u32 4294901760, %v61_v11  ;;  %v154_v15 = vsub.f32 %v40_v0, %v64_v3  ;;  %v48_v46 = vld [vmem:[#allocation2] ss:$0 sm:$0xff]  ;;  %s8159_s15 = smov 80   ;;  %s8160_s16 = smov 72  }
  0x16   :  { %v8232_v13 = vand.u32 4294901760, %v58_v10  ;;  %v8236_v16 = vpack.c.bf16 %v73_v9, %v70_v6  ;;  %v161_v17 = vsub.f32 %v41_v1, %v67_v4  ;;  %v168_v18 = vsub.f32 %v42_v2, %v70_v6  ;;  %s8161_s17 = smov 112   ;;  %s8162_s18 = smov 104  }
  0x17   :  { %v175_v19 = vsub.f32 %v43_v5, %v73_v9  ;;  %7532 = vmatprep.subr.bf16.mxu0 %v8230_v12  ;;  %v143_v21 = vsub.f32 %v61_v11, %v8234_v14  ;;  %v155_v22 = vand.u32 4294901760, %v154_v15  ;;  %vm2670_vm2 = vcmask 130048   ;;  %s8163_s27 = smov 64   ;;  %s8164_s9 = smov 56  }
  0x18   :  { %v133_v20 = vsub.f32 %v58_v10, %v8232_v13  ;;  %7534 = vmatpush3.bf16.msra.mxu0 %v8230_v12  ;;  %v162_v23 = vand.u32 4294901760, %v161_v17  ;;  %v169_v24 = vand.u32 4294901760, %v168_v18  ;;  %v7547_v42 = vpack.c.bf16 %v161_v17, %v154_v15  ;;  %s8166_s10 = smov 40   ;;  %s8167_s11 = smov 8  }
  0x19   :  { %v176_v25 = vand.u32 4294901760, %v175_v19  ;;  %7536 = vmatprep.subr.bf16.mxu0 %v8236_v16  ;;  %v144_v27 = vand.u32 4294901760, %v143_v21  ;;  %v156_v28 = vsub.f32 %v154_v15, %v155_v22  ;;  %v7551_v43 = vpack.c.bf16 %v175_v19, %v168_v18 }
  0x1a   :  { %v134_v26 = vand.u32 4294901760, %v133_v20  ;;  %v163_v29 = vsub.f32 %v161_v17, %v162_v23  ;;  %v170_v30 = vsub.f32 %v168_v18, %v169_v24  ;;  %v7563_v44 = vpack.c.bf16 %v162_v23, %v155_v22 }
  0x1b   :  { %v177_v31 = vsub.f32 %v175_v19, %v176_v25  ;;  %v145_v33 = vsub.f32 %v143_v21, %v144_v27  ;;  %v157_v34 = vand.u32 4294901760, %v156_v28  ;;  %v7567_v45 = vpack.c.bf16 %v176_v25, %v169_v24 }
  0x1c   :  { %v135_v32 = vsub.f32 %v133_v20, %v134_v26  ;;  %7538 = vmatpush3.bf16.msra.mxu0 %v8236_v16  ;;  %v164_v35 = vand.u32 4294901760, %v163_v29  ;;  %v171_v36 = vand.u32 4294901760, %v170_v30  ;;  %vm4867_vm3 = vcmask 195584  }
  0x1d   :  { %v178_v37 = vand.u32 4294901760, %v177_v31  ;;  %v146_v39 = vand.u32 4294901760, %v145_v33  ;;  %vm6001_vm4 = vcmask 523264  }
  0x1e   :  { %v136_v38 = vand.u32 4294901760, %v135_v32  ;;  %v7539_v40 = vpack.c.bf16 %v164_v35, %v157_v34 }
  0x1f   :  { %v7543_v41 = vpack.c.bf16 %v178_v37, %v171_v36 }
  0x20   :  { %6939 = vmatprep.mubr.f32.mxu0 %v136_v38  ;;  %7540 = vmatprep.subr.bf16.mxu0 %v7539_v40 }
  0x21   :  { %6940 = vmatmul.mubr.f32.vlgmr.msra.gmra.mrb[0].mxu0 %v146_v39 }
  0x22   :  { %7542 = vmatpush3.bf16.msra.mxu0 %v7539_v40  ;;  %6950 = vmatprep.mubr.f32.mxu0 %v8232_v13 }
  0x23   :  { %7544 = vmatprep.subr.bf16.mxu0 %v7543_v41 }
  0x26   :  { %7546 = vmatpush3.bf16.msra.mxu0 %v7543_v41 }
  0x27   :  { %7548 = vmatprep.subr.bf16.mxu0 %v7547_v42 }
  0x29   :  { %6951 = vmatmul.mubr.f32.vlgmr.msra.gmra.mrb[0].mxu0 %v8234_v14 }
  0x2a   :  { %7550 = vmatpush3.bf16.msra.mxu0 %v7547_v42  ;;  %6961 = vmatprep.mubr.f32.mxu0 %v133_v20 }
  0x2b   :  { %7552 = vmatprep.subr.bf16.mxu0 %v7551_v43 }
  0x2e   :  { %7554 = vmatpush3.bf16.msra.mxu0 %v7551_v43 }
  0x2f   :  { %7556 = vmatprep.subr.bf16.mxu0 %v8230_v12 }
  0x31   :  { %6962 = vmatmul.mubr.f32.vlgmr.msra.gmra.mrb[0].mxu0 %v143_v21 }
  0x32   :  { %7558 = vmatpush3.bf16.msra.mxu0 %v8230_v12  ;;  %6972 = vmatprep.mubr.f32.mxu0 %v134_v26 }
  0x33   :  { %7560 = vmatprep.subr.bf16.mxu0 %v8236_v16 }
  0x36   :  { %7562 = vmatpush3.bf16.msra.mxu0 %v8236_v16 }
  0x37   :  { %7564 = vmatprep.subr.bf16.mxu0 %v7563_v44 }
  0x39   :  { %6973 = vmatmul.mubr.f32.vlgmr.msra.gmra.mrb[0].mxu0 %v144_v27 }
  0x3a   :  { %7566 = vmatpush3.bf16.msra.mxu0 %v7563_v44  ;;  %6983 = vmatprep.mubr.f32.mxu0 %v8232_v13 }
  0x3b   :  { %7568 = vmatprep.subr.bf16.mxu0 %v7567_v45 }
  0x3e   :  { %7570 = vmatpush3.bf16.msra.mxu0 %v7567_v45 }
  0x3f   :  { %7572 = vmatprep.subr.bf16.mxu0 %v8230_v12 }
  0x41   :  { %6984 = vmatmul.mubr.f32.vlgmr.msra.gmra.mrb[0].mxu0 %v8234_v14 }
  0x42   :  { %7574 = vmatpush3.bf16.msra.mxu0 %v8230_v12  ;;  %6994 = vmatprep.mubr.f32.mxu0 %v8232_v13 }
  0x43   :  { %7576 = vmatprep.subr.bf16.mxu0 %v8236_v16 }
  0x46   :  { %7578 = vmatpush3.bf16.msra.mxu0 %v8236_v16 }
  0x49   :  { %6995 = vmatmul.mubr.f32.vlgmr.msra.gmra.mrb[0].mxu0 %v8234_v14 }
 0x11c   :  { %v6996_v47 = vpop.f32.mrb[0].mxu0 }
 0x11d   :  { %v8258_v48 = vadd.f32 %v6996_v47, %v48_v46  ;;  %v581_v49 = vpop.f32.mrb[1].mxu0 }
 0x11e   :  { %v8260_v50 = vadd.f32 %v581_v49, %v48_v46 }
 0x11f   :  { %1114 = vrot.lane.b32.xlu1 %v8258_v48, %s8156_s12  ;;  %v600_v57 = vsel %vm597_vm1, %v8258_v48, 0 }
 0x120   :  { %593 = vrot.lane.b32.xlu0 %v8260_v50, %s8157_s13  ;;  %v598_v51 = vsel %vm597_vm1, %v8260_v50, 0  ;;  %v8290_v61 = vand.u32 4294901760, %v600_v57 }
 0x121   :  { %v8266_v52 = vand.u32 4294901760, %v598_v51 }
 0x122   :  { %v8299_v6 = vsub.f32 %v600_v57, %v8290_v61 }
 0x123   :  { %1112 = vrot.lane.b32.xlu1 %v8260_v50, %s8156_s12  ;;  %v8270_v53 = vsub.f32 %v598_v51, %v8266_v52  ;;  %s8168_s12 = smov 16  }
 0x124   :  { %595 = vrot.lane.b32.xlu0 %v8258_v48, %s8157_s13  ;;  %v685_v19 = vand.u32 4294901760, %v8299_v6  ;;  %s8169_s13 = smov 24  }
 0x125   :  { %v675_v54 = vand.u32 4294901760, %v8270_v53 }
 0x126   :  { %v686_v31 = vsub.f32 %v8299_v6, %v685_v19 }
 0x127   :  { %1110 = vrot.lane.b32.xlu1 %v8258_v48, %s8158_s14  ;;  %v676_v55 = vsub.f32 %v8270_v53, %v675_v54 }
 0x128   :  { %1108 = vrot.lane.b32.xlu0 %v8260_v50, %s8158_s14  ;;  %v687_v40 = vand.u32 4294901760, %v686_v31 }
 0x129   :  { %v677_v56 = vand.u32 4294901760, %v676_v55 }
 0x12b   :  { %1632 = vrot.lane.b32.xlu1 %v8258_v48, %s8159_s15  ;;  %7001 = vmatprep.mubr.f32.mxu1 %v677_v56 }
 0x12c   :  { %2150 = vrot.lane.b32.xlu0 %v8258_v48, %s8160_s16 }
 0x12f   :  { %1628 = vrot.lane.b32.xlu1 %v8258_v48, %s8161_s17 }
 0x130   :  { %1630 = vrot.lane.b32.xlu0 %v8260_v50, %s8159_s15 }
 0x133   :  { %2148 = vrot.lane.b32.xlu1 %v8260_v50, %s8160_s16  ;;  %s8170_s16 = smov 32  }
 0x134   :  { %1626 = vrot.lane.b32.xlu0 %v8260_v50, %s8161_s17 }
 0x137   :  { %2146 = vrot.lane.b32.xlu1 %v8258_v48, %s8162_s18 }
 0x138   :  { %2144 = vrot.lane.b32.xlu0 %v8260_v50, %s8162_s18 }
 0x191   :  { %v1115_v58 = vpop.permute.xlu1 %1114 }
 0x192   :  { %v1122_v59 = vsel %vm597_vm1, %v1115_v58, 0  ;;  %v594_v60 = vpop.permute.xlu0 %593 }
 0x193   :  { %v1128_v62 = vand.u32 4294901760, %v1122_v59  ;;  %v602_v63 = vsel %vm597_vm1, %v594_v60, 0 }
 0x194   :  { %v607_v0 = vand.u32 4294901760, %v602_v63 }
 0x195   :  { %v8293_v1 = vsub.f32 %v1122_v59, %v1128_v62  ;;  %v1113_v2 = vpop.permute.xlu1 %1112 }
 0x196   :  { %v8295_v3 = vsub.f32 %v602_v63, %v607_v0  ;;  %v1120_v4 = vsel %vm597_vm1, %v1113_v2, 0  ;;  %v596_v5 = vpop.permute.xlu0 %595 }
 0x197   :  { %v1221_v7 = vand.u32 4294901760, %v8293_v1  ;;  %v1125_v8 = vand.u32 4294901760, %v1120_v4  ;;  %v604_v9 = vsel %vm597_vm1, %v596_v5, 0 }
 0x198   :  { %v696_v10 = vand.u32 4294901760, %v8295_v3  ;;  %v610_v11 = vand.u32 4294901760, %v604_v9 }
 0x199   :  { %v8304_v12 = vpack.c.bf16 %v1128_v62, %v1125_v8  ;;  %v8306_v13 = vsub.f32 %v1120_v4, %v1125_v8  ;;  %v1111_v14 = vpop.permute.xlu1 %1110  ;;  %v1222_v20 = vsub.f32 %v8293_v1, %v1221_v7 }
 0x19a   :  { %v8308_v15 = vpack.c.bf16 %v610_v11, %v607_v0  ;;  %v702_v16 = vsub.f32 %v604_v9, %v610_v11  ;;  %v1118_v17 = vsel %vm597_vm1, %v1111_v14, 0  ;;  %v1109_v18 = vpop.permute.xlu0 %1108  ;;  %v697_v24 = vsub.f32 %v8295_v3, %v696_v10 }
 0x19b   :  { %v1214_v21 = vand.u32 4294901760, %v8306_v13  ;;  %v8316_v22 = vand.u32 4294901760, %v1118_v17  ;;  %v1116_v23 = vsel %vm597_vm1, %v1109_v18, 0  ;;  %7604 = vmatprep.subr.bf16.mxu0 %v8304_v12  ;;  %v1223_v34 = vand.u32 4294901760, %v1222_v20 }
 0x19c   :  { %v703_v25 = vand.u32 4294901760, %v702_v16  ;;  %v8323_v26 = vand.u32 4294901760, %v1116_v23  ;;  %7580 = vmatprep.subr.bf16.mxu1 %v8308_v15  ;;  %7606 = vmatpush3.bf16.xpose.msra.mxu0 %v8304_v12  ;;  %v698_v36 = vand.u32 4294901760, %v697_v24  ;;  %v7587_v44 = vpack.c.bf16 %v702_v16, %v8295_v3 }
 0x19d   :  { %v1215_v27 = vsub.f32 %v8306_v13, %v1214_v21  ;;  %v8331_v28 = vsub.f32 %v1118_v17, %v8316_v22  ;;  %7582 = vmatpush3.bf16.xpose.msra.mxu1 %v8308_v15  ;;  %v7611_v47 = vpack.c.bf16 %v8293_v1, %v8306_v13  ;;  %v1633_v49 = vpop.permute.xlu1 %1632  ;;  %v7619_v62 = vpack.c.bf16 %v1221_v7, %v1214_v21 }
 0x19e   :  { %v704_v29 = vsub.f32 %v702_v16, %v703_v25  ;;  %v1192_v30 = vsub.f32 %v1116_v23, %v8323_v26  ;;  %v2151_v46 = vpop.permute.xlu0 %2150  ;;  %v7595_v57 = vpack.c.bf16 %v703_v25, %v696_v10  ;;  %v1640_v60 = vsel %vm597_vm1, %v1633_v49, 0 }
 0x19f   :  { %v1203_v32 = vand.u32 4294901760, %v8331_v28  ;;  %v1216_v33 = vand.u32 4294901760, %v1215_v27 }
 0x1a0   :  { %v1193_v35 = vand.u32 4294901760, %v1192_v30  ;;  %v705_v37 = vand.u32 4294901760, %v704_v29 }
 0x1a1   :  { %v1204_v38 = vsub.f32 %v8331_v28, %v1203_v32  ;;  %v7607_v39 = vpack.c.bf16 %v1223_v34, %v1216_v33  ;;  %v1629_v55 = vpop.permute.xlu1 %1628 }
 0x1a2   :  { %v7583_v41 = vpack.c.bf16 %v705_v37, %v698_v36  ;;  %v1194_v42 = vsub.f32 %v1192_v30, %v1193_v35  ;;  %v1631_v51 = vpop.permute.xlu0 %1630  ;;  %v1636_v11 = vsel %vm597_vm1, %v1629_v55, 0 }
 0x1a3   :  { %7608 = vmatprep.subr.bf16.mxu0 %v7607_v39  ;;  %v1205_v45 = vand.u32 4294901760, %v1204_v38  ;;  %v1638_v58 = vsel %vm597_vm1, %v1631_v51, 0 }
 0x1a4   :  { %7002 = vmatmul.mubr.f32.vlgmr.msra.gmra.mrb[0].mxu1 %v687_v40  ;;  %7584 = vmatprep.subr.bf16.mxu1 %v7583_v41  ;;  %v1195_v43 = vand.u32 4294901760, %v1194_v42  ;;  %v1643_v63 = vand.u32 4294901760, %v1638_v58 }
 0x1a5   :  { %7586 = vmatpush3.bf16.xpose.msra.mxu1 %v7583_v41  ;;  %7008 = vmatprep.mubr.f32.mxu1 %v8266_v52  ;;  %v2149_v59 = vpop.permute.xlu1 %2148 }
 0x1a6   :  { %7043 = vmatprep.mubr.f32.mxu0 %v1195_v43  ;;  %7588 = vmatprep.subr.bf16.mxu1 %v7587_v44  ;;  %v1627_v56 = vpop.permute.xlu0 %1626  ;;  %v2156_v0 = vsel %vm597_vm1, %v2149_v59, 0  ;;  %v8372_v1 = vsub.f32 %v1638_v58, %v1643_v63 }
 0x1a7   :  { %7044 = vmatmul.mubr.f32.vlgmr.msra.gmra.mrb[2].mxu0 %v1205_v45  ;;  %v1634_v2 = vsel %vm597_vm1, %v1627_v56, 0  ;;  %v2161_v4 = vand.u32 4294901760, %v2156_v0  ;;  %v33_v56 = vld [vmem:[%s8887_s1 + $0x8] sm:$0xff] }
 0x1a8   :  { %7610 = vmatpush3.bf16.xpose.msra.mxu0 %v7607_v39  ;;  %7050 = vmatprep.mubr.f32.mxu0 %v8323_v26  ;;  %v8369_v5 = vand.u32 4294901760, %v1634_v2 }
 0x1a9   :  { %7612 = vmatprep.subr.bf16.mxu0 %v7611_v47  ;;  %v8383_v13 = vsub.f32 %v2156_v0, %v2161_v4  ;;  %v2147_v16 = vpop.permute.xlu1 %2146 }
 0x1aa   :  { %v2145_v3 = vpop.permute.xlu0 %2144  ;;  %v8386_v14 = vsub.f32 %v1634_v2, %v8369_v5  ;;  %v2154_v20 = vsel %vm597_vm1, %v2147_v16, 0 }
 0x1ab   :  { %v2152_v8 = vsel %vm597_vm1, %v2145_v3, 0  ;;  %v2250_v23 = vand.u32 4294901760, %v8383_v13  ;;  %v8411_v29 = vand.u32 4294901760, %v2154_v20 }
 0x1ac   :  { %7009 = vmatmul.mubr.f32.vlgmr.msra.gmra.mrb[0].mxu1 %v8290_v61  ;;  %v8379_v10 = vand.u32 4294901760, %v2152_v8  ;;  %v1711_v24 = vand.u32 4294901760, %v8386_v14 }
 0x1ad   :  { %7590 = vmatpush3.bf16.xpose.msra.mxu1 %v7587_v44  ;;  %7015 = vmatprep.mubr.f32.mxu1 %v8270_v53  ;;  %v1646_v53 = vand.u32 4294901760, %v1640_v60  ;;  %v2251_v34 = vsub.f32 %v8383_v13, %v2250_v23  ;;  %v2238_v36 = vsub.f32 %v2154_v20, %v8411_v29 }
 0x1ae   :  { %7592 = vmatprep.subr.bf16.mxu1 %v8308_v15  ;;  %v8400_v21 = vsub.f32 %v2152_v8, %v8379_v10 }
 0x1af   :  { %7051 = vmatmul.mubr.f32.vlgmr.msra.gmra.mrb[2].mxu0 %v8316_v22  ;;  %v8377_v9 = vsub.f32 %v1640_v60, %v1646_v53  ;;  %v8404_v25 = vpack.c.bf16 %v1646_v53, %v1643_v63  ;;  %v2252_v41 = vand.u32 4294901760, %v2251_v34  ;;  %v34_v63 = vld [vmem:[%s8887_s1 + $0x10] sm:$0xff] }
 0x1b0   :  { %7614 = vmatpush3.bf16.xpose.msra.mxu0 %v7611_v47  ;;  %7057 = vmatprep.mubr.f32.mxu0 %v1192_v30 }
 0x1b1   :  { %7616 = vmatprep.subr.bf16.mxu0 %v8304_v12  ;;  %v1739_v18 = vand.u32 4294901760, %v8377_v9 }
 0x1b3   :  { %v1740_v30 = vsub.f32 %v8377_v9, %v1739_v18 }
 0x1b4   :  { %7016 = vmatmul.mubr.f32.vlgmr.msra.gmra.mrb[0].mxu1 %v8299_v6  ;;  %v1732_v6 = vand.u32 4294901760, %v8372_v1 }
 0x1b5   :  { %7594 = vmatpush3.bf16.xpose.msra.mxu1 %v8308_v15  ;;  %7022 = vmatprep.mubr.f32.mxu1 %v675_v54  ;;  %v2158_v54 = vsel %vm597_vm1, %v2151_v46, 0  ;;  %v1741_v38 = vand.u32 4294901760, %v1740_v30 }
 0x1b6   :  { %7596 = vmatprep.subr.bf16.mxu1 %v7595_v57  ;;  %v2164_v7 = vand.u32 4294901760, %v2158_v54  ;;  %v1733_v27 = vsub.f32 %v8372_v1, %v1732_v6  ;;  %v7643_v51 = vpack.c.bf16 %v1739_v18, %v1732_v6  ;;  %v36_v18 = vld [vmem:[%s8887_s1 + $0x20] sm:$0xff] }
 0x1b7   :  { %7058 = vmatmul.mubr.f32.vlgmr.msra.gmra.mrb[2].mxu0 %v8331_v28 }
 0x1b8   :  { %7618 = vmatpush3.bf16.xpose.msra.mxu0 %v8304_v12  ;;  %7064 = vmatprep.mubr.f32.mxu0 %v1193_v35  ;;  %v8392_v17 = vsub.f32 %v2158_v54, %v2164_v7  ;;  %v8423_v33 = vpack.c.bf16 %v2164_v7, %v2161_v4  ;;  %v35_v54 = vld [vmem:[%s8887_s1 + $0x18] sm:$0xff]  ;;  %v37_v7 = vld [vmem:[%s8887_s1 + $0x28] sm:$0xff] }
 0x1b9   :  { %7620 = vmatprep.subr.bf16.mxu0 %v7619_v62 }
 0x1ba   :  { %v2257_v28 = vand.u32 4294901760, %v8392_v17 }
 0x1bc   :  { %7023 = vmatmul.mubr.f32.vlgmr.msra.gmra.mrb[0].mxu1 %v685_v19  ;;  %v8396_v19 = vand.u32 4294901760, %v1636_v11  ;;  %v2258_v35 = vsub.f32 %v8392_v17, %v2257_v28  ;;  %v7667_v55 = vpack.c.bf16 %v2257_v28, %v2250_v23 }
 0x1bd   :  { %7598 = vmatpush3.bf16.xpose.msra.mxu1 %v7595_v57  ;;  %7029 = vmatprep.mubr.f32.mxu1 %v8266_v52  ;;  %v32_v57 = vld [vmem:[%s8887_s1] sm:$0xff] }
 0x1be   :  { %7600 = vmatprep.subr.bf16.mxu1 %v8308_v15  ;;  %v8419_v31 = vsub.f32 %v1636_v11, %v8396_v19  ;;  %v2259_v42 = vand.u32 4294901760, %v2258_v35 }
 0x1bf   :  { %7065 = vmatmul.mubr.f32.vlgmr.msra.gmra.mrb[2].mxu0 %v1203_v32  ;;  %v2229_v32 = vand.u32 4294901760, %v8400_v21 }
 0x1c0   :  { %7622 = vmatpush3.bf16.xpose.msra.mxu0 %v7619_v62  ;;  %7071 = vmatprep.mubr.f32.mxu0 %v8323_v26  ;;  %v1721_v37 = vand.u32 4294901760, %v8419_v31  ;;  %v7655_v45 = vpack.c.bf16 %v2259_v42, %v2252_v41 }
 0x1c1   :  { %7624 = vmatprep.subr.bf16.mxu0 %v8304_v12  ;;  %v2230_v39 = vsub.f32 %v8400_v21, %v2229_v32 }
 0x1c2   :  { %v1722_v43 = vsub.f32 %v8419_v31, %v1721_v37 }
 0x1c3   :  { %v2231_v44 = vand.u32 4294901760, %v2230_v39 }
 0x1c4   :  { %7030 = vmatmul.mubr.f32.vlgmr.msra.gmra.mrb[0].mxu1 %v8290_v61  ;;  %v1723_v47 = vand.u32 4294901760, %v1722_v43 }
 0x1c5   :  { %7602 = vmatpush3.bf16.xpose.msra.mxu1 %v8308_v15  ;;  %7036 = vmatprep.mubr.f32.mxu1 %v8266_v52  ;;  %v1712_v52 = vsub.f32 %v8386_v14, %v1711_v24  ;;  %v1734_v15 = vand.u32 4294901760, %v1733_v27 }
 0x1c6   :  { %7628 = vmatprep.subr.bf16.mxu1 %v8404_v25 }
 0x1c7   :  { %7072 = vmatmul.mubr.f32.vlgmr.msra.gmra.mrb[2].mxu0 %v8316_v22  ;;  %v1713_v40 = vand.u32 4294901760, %v1712_v52 }
 0x1c8   :  { %7626 = vmatpush3.bf16.xpose.msra.mxu0 %v8304_v12  ;;  %7078 = vmatprep.mubr.f32.mxu0 %v8323_v26  ;;  %v7631_v12 = vpack.c.bf16 %v1741_v38, %v1734_v15  ;;  %v2239_v26 = vand.u32 4294901760, %v2238_v36 }
 0x1c9   :  { %7652 = vmatprep.subr.bf16.mxu0 %v8423_v33 }
 0x1ca   :  { %v2240_v46 = vsub.f32 %v2238_v36, %v2239_v26 }
 0x1cc   :  { %7037 = vmatmul.mubr.f32.vlgmr.msra.gmra.mrb[0].mxu1 %v8290_v61  ;;  %v7635_v61 = vpack.c.bf16 %v8377_v9, %v8372_v1  ;;  %v2241_v49 = vand.u32 4294901760, %v2240_v46 }
 0x1cd   :  { %7630 = vmatpush3.bf16.xpose.msra.mxu1 %v8404_v25  ;;  %7085 = vmatprep.mubr.f32.mxu1 %v1713_v40 }
 0x1ce   :  { %7632 = vmatprep.subr.bf16.mxu1 %v7631_v12 }
 0x1cf   :  { %7079 = vmatmul.mubr.f32.vlgmr.msra.gmra.mrb[2].mxu0 %v8316_v22  ;;  %v7659_v22 = vpack.c.bf16 %v8392_v17, %v8383_v13  ;;  %v39_v13 = vld [vmem:[%s8887_s1 + $0x38] sm:$0xff] }
 0x1d0   :  { %7654 = vmatpush3.bf16.xpose.msra.mxu0 %v8423_v33  ;;  %7127 = vmatprep.mubr.f32.mxu0 %v2231_v44 }
 0x1d1   :  { %7656 = vmatprep.subr.bf16.mxu0 %v7655_v45 }
 0x1d4   :  { %7086 = vmatmul.mubr.f32.vlgmr.msra.gmra.mrb[2].mxu1 %v1723_v47 }
 0x1d5   :  { %7634 = vmatpush3.bf16.xpose.msra.mxu1 %v7631_v12  ;;  %7092 = vmatprep.mubr.f32.mxu1 %v8369_v5 }
 0x1d6   :  { %7636 = vmatprep.subr.bf16.mxu1 %v7635_v61 }
 0x1d7   :  { %7128 = vmatmul.mubr.f32.vlgmr.msra.gmra.mrb[4].mxu0 %v2241_v49 }
 0x1d8   :  { %7658 = vmatpush3.bf16.xpose.msra.mxu0 %v7655_v45  ;;  %7134 = vmatprep.mubr.f32.mxu0 %v8379_v10 }
 0x1d9   :  { %7660 = vmatprep.subr.bf16.mxu0 %v7659_v22 }
 0x1dc   :  { %7093 = vmatmul.mubr.f32.vlgmr.msra.gmra.mrb[2].mxu1 %v8396_v19 }
 0x1dd   :  { %7638 = vmatpush3.bf16.xpose.msra.mxu1 %v7635_v61  ;;  %7099 = vmatprep.mubr.f32.mxu1 %v8386_v14 }
 0x1de   :  { %7640 = vmatprep.subr.bf16.mxu1 %v8404_v25 }
 0x1df   :  { %7135 = vmatmul.mubr.f32.vlgmr.msra.gmra.mrb[4].mxu0 %v8411_v29 }
 0x1e0   :  { %7662 = vmatpush3.bf16.xpose.msra.mxu0 %v7659_v22  ;;  %7141 = vmatprep.mubr.f32.mxu0 %v8400_v21  ;;  %v38_v21 = vld [vmem:[%s8887_s1 + $0x30] sm:$0xff]  ;;  %s8165_s1 = smov 48  }
 0x1e1   :  { %7664 = vmatprep.subr.bf16.mxu0 %v8423_v33 }
 0x1e4   :  { %7100 = vmatmul.mubr.f32.vlgmr.msra.gmra.mrb[2].mxu1 %v8419_v31 }
 0x1e5   :  { %7642 = vmatpush3.bf16.xpose.msra.mxu1 %v8404_v25  ;;  %7106 = vmatprep.mubr.f32.mxu1 %v1711_v24 }
 0x1e6   :  { %7644 = vmatprep.subr.bf16.mxu1 %v7643_v51 }
 0x1e7   :  { %7142 = vmatmul.mubr.f32.vlgmr.msra.gmra.mrb[4].mxu0 %v2238_v36 }
 0x1e8   :  { %7666 = vmatpush3.bf16.xpose.msra.mxu0 %v8423_v33  ;;  %7148 = vmatprep.mubr.f32.mxu0 %v2229_v32 }
 0x1e9   :  { %7668 = vmatprep.subr.bf16.mxu0 %v7667_v55 }
 0x1ec   :  { %7107 = vmatmul.mubr.f32.vlgmr.msra.gmra.mrb[2].mxu1 %v1721_v37 }
 0x1ed   :  { %7646 = vmatpush3.bf16.xpose.msra.mxu1 %v7643_v51  ;;  %7113 = vmatprep.mubr.f32.mxu1 %v8369_v5 }
 0x1ee   :  { %7648 = vmatprep.subr.bf16.mxu1 %v8404_v25 }
 0x1ef   :  { %7149 = vmatmul.mubr.f32.vlgmr.msra.gmra.mrb[4].mxu0 %v2239_v26 }
 0x1f0   :  { %7670 = vmatpush3.bf16.xpose.msra.mxu0 %v7667_v55  ;;  %7155 = vmatprep.mubr.f32.mxu0 %v8379_v10 }
 0x1f1   :  { %7672 = vmatprep.subr.bf16.mxu0 %v8423_v33 }
 0x1f4   :  { %7114 = vmatmul.mubr.f32.vlgmr.msra.gmra.mrb[2].mxu1 %v8396_v19 }
 0x1f5   :  { %7650 = vmatpush3.bf16.xpose.msra.mxu1 %v8404_v25  ;;  %7120 = vmatprep.mubr.f32.mxu1 %v8369_v5 }
 0x1f7   :  { %7156 = vmatmul.mubr.f32.vlgmr.msra.gmra.mrb[4].mxu0 %v8411_v29 }
 0x1f8   :  { %7674 = vmatpush3.bf16.xpose.msra.mxu0 %v8423_v33  ;;  %7162 = vmatprep.mubr.f32.mxu0 %v8379_v10 }
 0x1fc   :  { %7121 = vmatmul.mubr.f32.vlgmr.msra.gmra.mrb[2].mxu1 %v8396_v19 }
 0x1ff   :  { %7163 = vmatmul.mubr.f32.vlgmr.msra.gmra.mrb[4].mxu0 %v8411_v29 }
 0x29f   :  { %v7038_v58 = vpop.f32.mrb[0].mxu1 }
 0x2a0   :  { %v2663_v59 = vadd.f32 %v7038_v58, %v33_v56  ;;  %v1098_v60 = vpop.f32.mrb[1].mxu1 }
 0x2a1   :  { %v2662_v62 = vadd.f32 %v1098_v60, %v32_v57 }
 0x2a2   :  { %v7080_v0 = vpop.f32.mrb[2].mxu0  ;;  %v2674_v2 = vsel %vm2670_vm2, %v2663_v59, -inf }
 0x2a3   :  { %v1616_v3 = vpop.f32.mrb[3].mxu0  ;;  %2675 = vmax.xlane.f32.xlu1 %v2674_v2  ;;  %v2671_v53 = vsel %vm2670_vm2, %v2662_v62, -inf  ;;  %v2665_v8 = vadd.f32 %v7080_v0, %v35_v54 }
 0x2a4   :  { %v2664_v4 = vadd.f32 %v1616_v3, %v34_v63  ;;  %2672 = vmax.xlane.f32.xlu0 %v2671_v53 }
 0x2a5   :  { %v2680_v1 = vsel %vm2670_vm2, %v2665_v8, -inf }
 0x2a6   :  { %v2677_v5 = vsel %vm2670_vm2, %v2664_v4, -inf }
 0x2a8   :  { %2678 = vmax.xlane.f32.xlu0 %v2677_v5 }
 0x2ac   :  { %2681 = vmax.xlane.f32.xlu0 %v2680_v1 }
 0x2b4   :  { %2783 = vrot.lane.b32.xlu1 %v8260_v50, %s8163_s27 }
 0x2cf   :  { %v7122_v9 = vpop.f32.mrb[2].mxu1 }
 0x2d0   :  { %v8504_v10 = vadd.f32 %v7122_v9, %v37_v7  ;;  %v2134_v11 = vpop.f32.mrb[3].mxu1 }
 0x2d1   :  { %v2666_v19 = vadd.f32 %v2134_v11, %v36_v18 }
 0x2d2   :  { %v7164_v14 = vpop.f32.mrb[4].mxu0  ;;  %v2686_v16 = vsel %vm2670_vm2, %v8504_v10, -inf }
 0x2d3   :  { %v8511_v6 = vadd.f32 %v7164_v14, %v39_v13  ;;  %v2652_v17 = vpop.f32.mrb[5].mxu0  ;;  %2687 = vmax.xlane.f32.xlu0 %v2686_v16  ;;  %v2683_v24 = vsel %vm2670_vm2, %v2666_v19, -inf }
 0x2d4   :  { %v2668_v23 = vadd.f32 %v2652_v17, %v38_v21 }
 0x2d5   :  { %v2692_v20 = vsel %vm2670_vm2, %v8511_v6, -inf }
 0x2d6   :  { %v2689_v25 = vsel %vm2670_vm2, %v2668_v23, -inf }
 0x2d8   :  { %2693 = vmax.xlane.f32.xlu1 %v2692_v20 }
 0x2dc   :  { %2684 = vmax.xlane.f32.xlu1 %v2683_v24 }
 0x2e0   :  { %2690 = vmax.xlane.f32.xlu1 %v2689_v25 }
 0x2f1   :  { %3297 = vrot.lane.b32.xlu1 %v8260_v50, %s8164_s9 }
 0x330   :  { %v2676_v27 = vpop.xlane.xlu1 %2675 }
 0x331   :  { %v2696_v28 = vsub.f32 %v2663_v59, %v2676_v27  ;;  %v2673_v29 = vpop.xlane.xlu0 %2672 }
 0x332   :  { %v2695_v30 = vsub.f32 %v2662_v62, %v2673_v29 }
 0x333   :  { %v2705_v31 = vmul.f32 1.442695, %v2696_v28 }
 0x334   :  { %v2703_v32 = vmul.f32 1.442695, %v2695_v30  ;;  %v2784_v40 = vpop.permute.xlu1 %2783 }
 0x335   :  { %8061 = vpow2.f32 %v2705_v31  ;;  %v2679_v33 = vpop.xlane.xlu0 %2678  ;;  %v2796_v54 = vand.u32 4294901760, %v2784_v40 }
 0x336   :  { %v2697_v34 = vsub.f32 %v2664_v4, %v2679_v33  ;;  %8063 = vpow2.f32 %v2703_v32 }
 0x337   :  { %v2884_v5 = vsub.f32 %v2784_v40, %v2796_v54 }
 0x338   :  { %v2707_v52 = vmul.f32 1.442695, %v2697_v34 }
 0x339   :  { %v2682_v41 = vpop.xlane.xlu0 %2681  ;;  %v2885_v1 = vand.u32 4294901760, %v2884_v5 }
 0x33a   :  { %8065 = vpow2.f32 %v2707_v52  ;;  %v2698_v12 = vsub.f32 %v2665_v8, %v2682_v41 }
 0x33b   :  { %v2886_v14 = vsub.f32 %v2884_v5, %v2885_v1 }
 0x33c   :  { %v2709_v42 = vmul.f32 1.442695, %v2698_v12 }
 0x33d   :  { %v2887_v20 = vand.u32 4294901760, %v2886_v14 }
 0x33e   :  { %8067 = vpow2.f32 %v2709_v42 }
 0x33f   :  { %v8525_v15 = vpop.eup %8061 }
 0x340   :  { %v2722_v35 = vsel %vm2670_vm2, %v8525_v15, 0.0  ;;  %v8529_v36 = vpop.eup %8063 }
 0x341   :  { %2723 = vadd.xlane.f32.xlu0 %v2722_v35  ;;  %v2719_v38 = vsel %vm2670_vm2, %v8529_v36, 0.0 }
 0x344   :  { %v8531_v37 = vpop.eup %8065 }
 0x345   :  { %2720 = vadd.xlane.f32.xlu0 %v2719_v38  ;;  %v2725_v39 = vsel %vm2670_vm2, %v8531_v37, 0.0 }
 0x346   :  { %2726 = vadd.xlane.f32.xlu1 %v2725_v39 }
 0x348   :  { %v8541_v49 = vpop.eup %8067 }
 0x349   :  { %v2728_v51 = vsel %vm2670_vm2, %v8541_v49, 0.0 }
 0x357   :  { %3811 = vrot.lane.b32.xlu1 %v8260_v50, %s8165_s1 }
 0x35b   :  { %2785 = vrot.lane.b32.xlu0 %v8258_v48, %s8163_s27 }
 0x360   :  { %v2688_v58 = vpop.xlane.xlu0 %2687 }
 0x361   :  { %v2700_v59 = vsub.f32 %v8504_v10, %v2688_v58 }
 0x363   :  { %v2713_v60 = vmul.f32 1.442695, %v2700_v59 }
 0x365   :  { %v2694_v26 = vpop.xlane.xlu1 %2693 }
 0x366   :  { %v2702_v62 = vsub.f32 %v8511_v6, %v2694_v26 }
 0x368   :  { %v2717_v63 = vmul.f32 1.442695, %v2702_v62 }
 0x369   :  { %v2685_v43 = vpop.xlane.xlu1 %2684 }
 0x36a   :  { %v2699_v44 = vsub.f32 %v2666_v19, %v2685_v43 }
 0x36c   :  { %v2711_v45 = vmul.f32 1.442695, %v2699_v44 }
 0x36d   :  { %v2691_v46 = vpop.xlane.xlu1 %2690 }
 0x36e   :  { %8069 = vpow2.f32 %v2711_v45  ;;  %v2701_v47 = vsub.f32 %v2668_v23, %v2691_v46 }
 0x370   :  { %v2715_v61 = vmul.f32 1.442695, %v2701_v47 }
 0x371   :  { %v3298_v27 = vpop.permute.xlu1 %3297 }
 0x372   :  { %8071 = vpow2.f32 %v2715_v61 }
 0x373   :  { %8073 = vpow2.f32 %v2713_v60 }
 0x374   :  { %8075 = vpow2.f32 %v2717_v63 }
 0x378   :  { %v8543_v22 = vpop.eup %8069 }
 0x379   :  { %v2731_v55 = vsel %vm2670_vm2, %v8543_v22, 0.0 }
 0x37a   :  { %2729 = vadd.xlane.f32.xlu0 %v2728_v51 }
 0x37b   :  { %2732 = vadd.xlane.f32.xlu1 %v2731_v55  ;;  %v3310_v55 = vand.u32 4294901760, %v3298_v27 }
 0x37c   :  { %v8549_v56 = vpop.eup %8071 }
 0x37d   :  { %v2737_v57 = vsel %vm2670_vm2, %v8549_v56, 0.0  ;;  %v8559_v0 = vpop.eup %8073  ;;  %v8589_v59 = vsub.f32 %v3298_v27, %v3310_v55 }
 0x37e   :  { %v2734_v2 = vsel %vm2670_vm2, %v8559_v0, 0.0  ;;  %v8563_v3 = vpop.eup %8075 }
 0x37f   :  { %2738 = vadd.xlane.f32.xlu1 %v2737_v57 }
 0x390   :  { %3299 = vrot.lane.b32.xlu0 %v8258_v48, %s8164_s9  ;;  %4325 = vrot.lane.b32.xlu1 %v8260_v50, %s8166_s10  ;;  %v2740_v50 = vsel %vm2670_vm2, %v8563_v3, 0.0 }
 0x394   :  { %4327 = vrot.lane.b32.xlu1 %v8258_v48, %s8166_s10 }
 0x3af   :  { %2735 = vadd.xlane.f32.xlu0 %v2734_v2  ;;  %v3399_v2 = vand.u32 4294901760, %v8589_v59 }
 0x3b3   :  { %2741 = vadd.xlane.f32.xlu0 %v2740_v50 }
 0x3c9   :  { %3813 = vrot.lane.b32.xlu0 %v8258_v48, %s8165_s1 }
 0x3ce   :  { %v2724_v53 = vpop.xlane.xlu0 %2723 }
 0x3cf   :  { %8077 = vrcp.f32 %v2724_v53 }
 0x3d2   :  { %v2721_v4 = vpop.xlane.xlu0 %2720 }
 0x3d3   :  { %8079 = vrcp.f32 %v2721_v4  ;;  %v2727_v34 = vpop.xlane.xlu1 %2726 }
 0x3d4   :  { %8081 = vrcp.f32 %v2727_v34 }
 0x3d6   :  { %v2786_v8 = vpop.permute.xlu0 %2785 }
 0x3d7   :  { %v2799_v7 = vand.u32 4294901760, %v2786_v8  ;;  %v8584_v47 = vpop.permute.xlu1 %3811 }
 0x3d9   :  { %v8078_v9 = vpop.eup %8077  ;;  %v8569_v10 = vpack.c.bf16 %v2799_v7, %v2796_v54  ;;  %v2891_v11 = vsub.f32 %v2786_v8, %v2799_v7  ;;  %v3400_v7 = vsub.f32 %v8589_v59, %v3399_v2 }
 0x3da   :  { %v2752_v13 = vmul.f32 %v8078_v9, %v2724_v53 }
 0x3db   :  { %v2892_v16 = vand.u32 4294901760, %v2891_v11  ;;  %7676 = vmatprep.subr.bf16.mxu1 %v8569_v10  ;;  %v7683_v26 = vpack.c.bf16 %v2891_v11, %v2884_v5 }
 0x3dc   :  { %v2760_v6 = vsub.f32 2.0, %v2752_v13  ;;  %7678 = vmatpush3.bf16.msra.mxu1 %v8569_v10 }
 0x3dd   :  { %v8080_v48 = vpop.eup %8079  ;;  %v2893_v17 = vsub.f32 %v2891_v11, %v2892_v16  ;;  %v7691_v46 = vpack.c.bf16 %v2892_v16, %v2885_v1 }
 0x3de   :  { %v2768_v18 = vmul.f32 %v8078_v9, %v2760_v6  ;;  %v2751_v19 = vmul.f32 %v8080_v48, %v2721_v4  ;;  %v8082_v42 = vpop.eup %8081 }
 0x3df   :  { %v2894_v21 = vand.u32 4294901760, %v2893_v17  ;;  %v3401_v17 = vand.u32 4294901760, %v3400_v7 }
 0x3e0   :  { %v2776_v23 = vmul.f32 %v8525_v15, %v2768_v18  ;;  %v2759_v24 = vsub.f32 2.0, %v2751_v19 }
 0x3e1   :  { %v7679_v25 = vpack.c.bf16 %v2894_v21, %v2887_v20 }
 0x3e2   :  { %v2793_v28 = vsel %vm2670_vm2, %v2776_v23, 0  ;;  %v2767_v29 = vmul.f32 %v8080_v48, %v2759_v24 }
 0x3e3   :  { %v8575_v30 = vand.u32 4294901760, %v2793_v28  ;;  %7680 = vmatprep.subr.bf16.mxu1 %v7679_v25 }
 0x3e4   :  { %v2775_v31 = vmul.f32 %v8529_v36, %v2767_v29  ;;  %v2753_v36 = vmul.f32 %v8082_v42, %v2727_v34 }
 0x3e5   :  { %v2873_v32 = vsub.f32 %v2793_v28, %v8575_v30 }
 0x3e6   :  { %v2790_v33 = vsel %vm2670_vm2, %v2775_v31, 0  ;;  %v2761_v43 = vsub.f32 2.0, %v2753_v36 }
 0x3e7   :  { %v2862_v52 = vand.u32 4294901760, %v2790_v33  ;;  %v2874_v35 = vand.u32 4294901760, %v2873_v32 }
 0x3e8   :  { %v2769_v44 = vmul.f32 %v8082_v42, %v2761_v43 }
 0x3e9   :  { %v2863_v15 = vsub.f32 %v2790_v33, %v2862_v52  ;;  %v2875_v39 = vsub.f32 %v2873_v32, %v2874_v35 }
 0x3ea   :  { %v2777_v45 = vmul.f32 %v8531_v37, %v2769_v44  ;;  %v3824_v44 = vand.u32 4294901760, %v8584_v47 }
 0x3eb   :  { %v2864_v38 = vand.u32 4294901760, %v2863_v15  ;;  %v2876_v12 = vand.u32 4294901760, %v2875_v39 }
 0x3ec   :  { %v3304_v61 = vsel %vm2670_vm2, %v2777_v45, 0 }
 0x3ed   :  { %v2865_v40 = vsub.f32 %v2863_v15, %v2864_v38  ;;  %v8587_v58 = vand.u32 4294901760, %v3304_v61 }
 0x3ef   :  { %v2866_v41 = vand.u32 4294901760, %v2865_v40  ;;  %v8593_v62 = vsub.f32 %v3304_v61, %v8587_v58 }
 0x3f1   :  { %7169 = vmatprep.mubr.f32.mxu1 %v2866_v41  ;;  %v3378_v53 = vand.u32 4294901760, %v8593_v62 }
 0x3f2   :  { %7170 = vmatmul.mubr.f32.vlgmr.msra.gmra.mrb[4].mxu1 %v2876_v12 }
 0x3f3   :  { %7682 = vmatpush3.bf16.msra.mxu1 %v7679_v25  ;;  %7176 = vmatprep.mubr.f32.mxu1 %v2862_v52  ;;  %v3379_v13 = vsub.f32 %v8593_v62, %v3378_v53 }
 0x3f4   :  { %7684 = vmatprep.subr.bf16.mxu1 %v7683_v26 }
 0x3f5   :  { %v3380_v19 = vand.u32 4294901760, %v3379_v13 }
 0x3fa   :  { %7177 = vmatmul.mubr.f32.vlgmr.msra.gmra.mrb[4].mxu1 %v8575_v30 }
 0x3fb   :  { %7686 = vmatpush3.bf16.msra.mxu1 %v7683_v26  ;;  %7183 = vmatprep.mubr.f32.mxu1 %v2863_v15 }
 0x3fc   :  { %7688 = vmatprep.subr.bf16.mxu1 %v8569_v10 }
 0x402   :  { %7184 = vmatmul.mubr.f32.vlgmr.msra.gmra.mrb[4].mxu1 %v2873_v32 }
 0x403   :  { %7690 = vmatpush3.bf16.msra.mxu1 %v8569_v10  ;;  %7190 = vmatprep.mubr.f32.mxu1 %v2864_v38 }
 0x404   :  { %7692 = vmatprep.subr.bf16.mxu1 %v7691_v46 }
 0x407   :  { %v2730_v51 = vpop.xlane.xlu0 %2729 }
 0x408   :  { %8083 = vrcp.f32 %v2730_v51  ;;  %v2733_v57 = vpop.xlane.xlu1 %2732 }
 0x409   :  { %8085 = vrcp.f32 %v2733_v57 }
 0x40a   :  { %7191 = vmatmul.mubr.f32.vlgmr.msra.gmra.mrb[4].mxu1 %v2874_v35 }
 0x40b   :  { %7694 = vmatpush3.bf16.msra.mxu1 %v7691_v46  ;;  %7197 = vmatprep.mubr.f32.mxu1 %v2862_v52  ;;  %v3300_v37 = vpop.permute.xlu0 %3299 }
 0x40c   :  { %7696 = vmatprep.subr.bf16.mxu1 %v8569_v10  ;;  %v3313_v60 = vand.u32 4294901760, %v3300_v37 }
 0x40e   :  { %v3405_v63 = vsub.f32 %v3300_v37, %v3313_v60  ;;  %v8597_v4 = vpack.c.bf16 %v3313_v60, %v3310_v55 }
 0x410   :  { %v3406_v50 = vand.u32 4294901760, %v3405_v63  ;;  %v7707_v34 = vpack.c.bf16 %v3405_v63, %v8589_v59 }
 0x412   :  { %v8084_v54 = vpop.eup %8083  ;;  %v3407_v5 = vsub.f32 %v3405_v63, %v3406_v50  ;;  %7198 = vmatmul.mubr.f32.vlgmr.msra.gmra.mrb[4].mxu1 %v8575_v30  ;;  %v7715_v41 = vpack.c.bf16 %v3406_v50, %v3399_v2 }
 0x413   :  { %v8086_v8 = vpop.eup %8085  ;;  %v2754_v1 = vmul.f32 %v8084_v54, %v2730_v51  ;;  %7698 = vmatpush3.bf16.msra.mxu1 %v8569_v10  ;;  %7204 = vmatprep.mubr.f32.mxu1 %v2862_v52  ;;  %v2739_v10 = vpop.xlane.xlu1 %2738  ;;  %v8640_v51 = vsub.f32 %v8584_v47, %v3824_v44 }
 0x414   :  { %v2755_v9 = vmul.f32 %v8086_v8, %v2733_v57  ;;  %7700 = vmatprep.subr.bf16.mxu1 %v8597_v4  ;;  %v3408_v16 = vand.u32 4294901760, %v3407_v5  ;;  %8087 = vrcp.f32 %v2739_v10 }
 0x415   :  { %v2762_v11 = vsub.f32 2.0, %v2754_v1  ;;  %v3913_v60 = vand.u32 4294901760, %v8640_v51 }
 0x416   :  { %v2763_v14 = vsub.f32 2.0, %v2755_v9  ;;  %v7703_v21 = vpack.c.bf16 %v3408_v16, %v3401_v17 }
 0x417   :  { %v2770_v6 = vmul.f32 %v8084_v54, %v2762_v11  ;;  %v4326_v38 = vpop.permute.xlu1 %4325  ;;  %v3914_v1 = vsub.f32 %v8640_v51, %v3913_v60 }
 0x418   :  { %v2771_v48 = vmul.f32 %v8086_v8, %v2763_v14  ;;  %v4338_v36 = vand.u32 4294901760, %v4326_v38 }
 0x419   :  { %v2778_v18 = vmul.f32 %v8541_v49, %v2770_v6  ;;  %v3915_v17 = vand.u32 4294901760, %v3914_v1 }
 0x41a   :  { %v2779_v20 = vmul.f32 %v8543_v22, %v2771_v48  ;;  %7205 = vmatmul.mubr.f32.vlgmr.msra.gmra.mrb[4].mxu1 %v8575_v30 }
 0x41b   :  { %v3307_v23 = vsel %vm2670_vm2, %v2778_v18, 0  ;;  %7702 = vmatpush3.bf16.msra.mxu1 %v8597_v4  ;;  %7211 = vmatprep.mubr.f32.mxu1 %v3380_v19  ;;  %v4328_v12 = vpop.permute.xlu1 %4327 }
 0x41c   :  { %v8609_v24 = vand.u32 4294901760, %v3307_v23  ;;  %v3818_v25 = vsel %vm2670_vm2, %v2779_v20, 0  ;;  %7704 = vmatprep.subr.bf16.mxu1 %v7703_v21  ;;  %v4341_v42 = vand.u32 4294901760, %v4328_v12 }
 0x41d   :  { %v8612_v27 = vand.u32 4294901760, %v3818_v25 }
 0x41e   :  { %v3387_v49 = vsub.f32 %v3307_v23, %v8609_v24  ;;  %v8088_v52 = vpop.eup %8087  ;;  %v8633_v46 = vsub.f32 %v4328_v12, %v4341_v42  ;;  %v8649_v2 = vpack.c.bf16 %v4341_v42, %v4338_v36 }
 0x41f   :  { %v8616_v22 = vsub.f32 %v3818_v25, %v8612_v27  ;;  %v2757_v35 = vmul.f32 %v8088_v52, %v2739_v10 }
 0x420   :  { %v3388_v28 = vand.u32 4294901760, %v3387_v49  ;;  %v4434_v57 = vand.u32 4294901760, %v8633_v46 }
 0x421   :  { %v3892_v29 = vand.u32 4294901760, %v8616_v22  ;;  %v2765_v15 = vsub.f32 2.0, %v2757_v35 }
 0x422   :  { %v3389_v30 = vsub.f32 %v3387_v49, %v3388_v28  ;;  %v4435_v47 = vsub.f32 %v8633_v46, %v4434_v57 }
 0x423   :  { %v3893_v31 = vsub.f32 %v8616_v22, %v3892_v29  ;;  %v2773_v39 = vmul.f32 %v8088_v52, %v2765_v15 }
 0x424   :  { %v3390_v32 = vand.u32 4294901760, %v3389_v30  ;;  %v4436_v9 = vand.u32 4294901760, %v4435_v47 }
 0x425   :  { %v3894_v33 = vand.u32 4294901760, %v3893_v31  ;;  %v2781_v40 = vmul.f32 %v8549_v56, %v2773_v39  ;;  %v8636_v56 = vsub.f32 %v4326_v38, %v4338_v36 }
 0x426   :  { %7212 = vmatmul.mubr.f32.vlgmr.msra.gmra.mrb[6].mxu1 %v3390_v32 }
 0x427   :  { %7706 = vmatpush3.bf16.msra.mxu1 %v7703_v21  ;;  %7218 = vmatprep.mubr.f32.mxu1 %v8587_v58  ;;  %v4332_v26 = vsel %vm2670_vm2, %v2781_v40, 0  ;;  %v4427_v37 = vand.u32 4294901760, %v8636_v56 }
 0x428   :  { %7708 = vmatprep.subr.bf16.mxu1 %v7707_v34  ;;  %7253 = vmatprep.mubr.f32.mxu0 %v3894_v33  ;;  %v8631_v45 = vand.u32 4294901760, %v4332_v26 }
 0x429   :  { %v4428_v5 = vsub.f32 %v8636_v56, %v4427_v37  ;;  %v7763_v40 = vpack.c.bf16 %v4434_v57, %v4427_v37 }
 0x42a   :  { %v8643_v55 = vsub.f32 %v4332_v26, %v8631_v45 }
 0x42b   :  { %v4429_v6 = vand.u32 4294901760, %v4428_v5 }
 0x42c   :  { %v4406_v63 = vand.u32 4294901760, %v8643_v55 }
 0x42d   :  { %v7751_v10 = vpack.c.bf16 %v4436_v9, %v4429_v6 }
 0x42e   :  { %7219 = vmatmul.mubr.f32.vlgmr.msra.gmra.mrb[6].mxu1 %v8609_v24 }
 0x42f   :  { %7710 = vmatpush3.bf16.msra.mxu1 %v7707_v34  ;;  %7225 = vmatprep.mubr.f32.mxu1 %v8593_v62 }
 0x430   :  { %7712 = vmatprep.subr.bf16.mxu1 %v8597_v4 }
 0x436   :  { %7226 = vmatmul.mubr.f32.vlgmr.msra.gmra.mrb[6].mxu1 %v3387_v49 }
 0x437   :  { %7714 = vmatpush3.bf16.msra.mxu1 %v8597_v4  ;;  %7232 = vmatprep.mubr.f32.mxu1 %v3378_v53 }
 0x438   :  { %7716 = vmatprep.subr.bf16.mxu1 %v7715_v41 }
 0x43c   :  { %v2736_v43 = vpop.xlane.xlu0 %2735 }
 0x43d   :  { %8089 = vrcp.f32 %v2736_v43 }
 0x43e   :  { %7233 = vmatmul.mubr.f32.vlgmr.msra.gmra.mrb[6].mxu1 %v3388_v28 }
 0x43f   :  { %7718 = vmatpush3.bf16.msra.mxu1 %v7715_v41  ;;  %7239 = vmatprep.mubr.f32.mxu1 %v8587_v58 }
 0x440   :  { %7720 = vmatprep.subr.bf16.mxu1 %v8597_v4  ;;  %v2742_v61 = vpop.xlane.xlu0 %2741 }
 0x441   :  { %8091 = vrcp.f32 %v2742_v61 }
 0x444   :  { %v3814_v59 = vpop.permute.xlu0 %3813 }
 0x445   :  { %v3827_v62 = vand.u32 4294901760, %v3814_v59 }
 0x446   :  { %7240 = vmatmul.mubr.f32.vlgmr.msra.gmra.mrb[6].mxu1 %v8609_v24 }
 0x447   :  { %v8090_v50 = vpop.eup %8089  ;;  %v8655_v53 = vpack.c.bf16 %v3827_v62, %v3824_v44  ;;  %v8657_v54 = vsub.f32 %v3814_v59, %v3827_v62  ;;  %7722 = vmatpush3.bf16.msra.mxu1 %v8597_v4  ;;  %7246 = vmatprep.mubr.f32.mxu1 %v8587_v58  ;;  %v4407_v4 = vsub.f32 %v8643_v55, %v4406_v63  ;;  %v8102_v44 = vld [vmem:[%s8888_s2] sm:$0xff] }
 0x448   :  { %v2756_v8 = vmul.f32 %v8090_v50, %v2736_v43  ;;  %7748 = vmatprep.subr.bf16.mxu1 %v8649_v2  ;;  %v8101_v43 = vld [vmem:[%s8888_s2 + $0x10] sm:$0xff] }
 0x449   :  { %v3920_v7 = vand.u32 4294901760, %v8657_v54  ;;  %7724 = vmatprep.subr.bf16.mxu0 %v8655_v53  ;;  %v4408_v48 = vand.u32 4294901760, %v4407_v4  ;;  %v7731_v35 = vpack.c.bf16 %v8657_v54, %v8640_v51 }
 0x44a   :  { %v2764_v58 = vsub.f32 2.0, %v2756_v8  ;;  %7726 = vmatpush3.bf16.msra.mxu0 %v8655_v53 }
 0x44b   :  { %v8092_v11 = vpop.eup %8091  ;;  %v3921_v13 = vsub.f32 %v8657_v54, %v3920_v7  ;;  %v7739_v39 = vpack.c.bf16 %v3920_v7, %v3913_v60 }
 0x44c   :  { %v2772_v14 = vmul.f32 %v8090_v50, %v2764_v58  ;;  %v2758_v16 = vmul.f32 %v8092_v11, %v2742_v61 }
 0x44d   :  { %v3922_v18 = vand.u32 4294901760, %v3921_v13 }
 0x44e   :  { %v2780_v19 = vmul.f32 %v8559_v0, %v2772_v14  ;;  %v2766_v20 = vsub.f32 2.0, %v2758_v16  ;;  %7247 = vmatmul.mubr.f32.vlgmr.msra.gmra.mrb[6].mxu1 %v8609_v24 }
 0x44f   :  { %7750 = vmatpush3.bf16.msra.mxu1 %v8649_v2  ;;  %7295 = vmatprep.mubr.f32.mxu1 %v4408_v48  ;;  %v7727_v21 = vpack.c.bf16 %v3922_v18, %v3915_v17 }
 0x450   :  { %v3821_v23 = vsel %vm2670_vm2, %v2780_v19, 0  ;;  %v2774_v25 = vmul.f32 %v8092_v11, %v2766_v20  ;;  %7752 = vmatprep.subr.bf16.mxu1 %v7751_v10 }
 0x451   :  { %v3900_v49 = vand.u32 4294901760, %v3821_v23  ;;  %7728 = vmatprep.subr.bf16.mxu0 %v7727_v21 }
 0x452   :  { %v2782_v28 = vmul.f32 %v8563_v3, %v2774_v25  ;;  %v7755_v3 = vpack.c.bf16 %v8633_v46, %v8636_v56  ;;  %v8104_v46 = vld [vmem:[%s8888_s2 + $0x20] sm:$0xff] }
 0x453   :  { %v3901_v30 = vsub.f32 %v3821_v23, %v3900_v49 }
 0x454   :  { %v4335_v31 = vsel %vm2670_vm2, %v2782_v28, 0 }
 0x455   :  { %v4414_v0 = vand.u32 4294901760, %v4335_v31  ;;  %v3902_v32 = vand.u32 4294901760, %v3901_v30 }
 0x457   :  { %v4415_v33 = vsub.f32 %v4335_v31, %v4414_v0  ;;  %v3903_v24 = vsub.f32 %v3901_v30, %v3902_v32 }
 0x459   :  { %v3904_v34 = vand.u32 4294901760, %v3903_v24  ;;  %v4416_v52 = vand.u32 4294901760, %v4415_v33 }
 0x45b   :  { %7254 = vmatmul.mubr.f32.vlgmr.msra.gmra.mrb[6].mxu0 %v3904_v34  ;;  %v4417_v15 = vsub.f32 %v4415_v33, %v4416_v52 }
 0x45c   :  { %7730 = vmatpush3.bf16.msra.mxu0 %v7727_v21  ;;  %7260 = vmatprep.mubr.f32.mxu0 %v8612_v27 }
 0x45d   :  { %7732 = vmatprep.subr.bf16.mxu0 %v7731_v35  ;;  %v4418_v38 = vand.u32 4294901760, %v4417_v15 }
 0x45f   :  { %7296 = vmatmul.mubr.f32.vlgmr.msra.gmra.mrb[8].mxu1 %v4418_v38 }
 0x460   :  { %7754 = vmatpush3.bf16.msra.mxu1 %v7751_v10  ;;  %7302 = vmatprep.mubr.f32.mxu1 %v8631_v45 }
 0x461   :  { %7756 = vmatprep.subr.bf16.mxu1 %v7755_v3 }
 0x463   :  { %7261 = vmatmul.mubr.f32.vlgmr.msra.gmra.mrb[6].mxu0 %v3900_v49 }
 0x464   :  { %7734 = vmatpush3.bf16.msra.mxu0 %v7731_v35  ;;  %7267 = vmatprep.mubr.f32.mxu0 %v8616_v22 }
 0x465   :  { %7736 = vmatprep.subr.bf16.mxu0 %v8655_v53 }
 0x467   :  { %7303 = vmatmul.mubr.f32.vlgmr.msra.gmra.mrb[8].mxu1 %v4414_v0 }
 0x468   :  { %7758 = vmatpush3.bf16.msra.mxu1 %v7755_v3  ;;  %7309 = vmatprep.mubr.f32.mxu1 %v8643_v55 }
 0x469   :  { %7760 = vmatprep.subr.bf16.mxu1 %v8649_v2 }
 0x46b   :  { %7268 = vmatmul.mubr.f32.vlgmr.msra.gmra.mrb[6].mxu0 %v3901_v30 }
 0x46c   :  { %7738 = vmatpush3.bf16.msra.mxu0 %v8655_v53  ;;  %7274 = vmatprep.mubr.f32.mxu0 %v3892_v29 }
 0x46d   :  { %7740 = vmatprep.subr.bf16.mxu0 %v7739_v39 }
 0x46f   :  { %7310 = vmatmul.mubr.f32.vlgmr.msra.gmra.mrb[8].mxu1 %v4415_v33 }
 0x470   :  { %7762 = vmatpush3.bf16.msra.mxu1 %v8649_v2  ;;  %7316 = vmatprep.mubr.f32.mxu1 %v4406_v63 }
 0x471   :  { %7764 = vmatprep.subr.bf16.mxu1 %v7763_v40 }
 0x473   :  { %7275 = vmatmul.mubr.f32.vlgmr.msra.gmra.mrb[6].mxu0 %v3902_v32 }
 0x474   :  { %7742 = vmatpush3.bf16.msra.mxu0 %v7739_v39  ;;  %7281 = vmatprep.mubr.f32.mxu0 %v8612_v27 }
 0x475   :  { %7744 = vmatprep.subr.bf16.mxu0 %v8655_v53 }
 0x477   :  { %7317 = vmatmul.mubr.f32.vlgmr.msra.gmra.mrb[8].mxu1 %v4416_v52 }
 0x478   :  { %7766 = vmatpush3.bf16.msra.mxu1 %v7763_v40  ;;  %7323 = vmatprep.mubr.f32.mxu1 %v8631_v45 }
 0x479   :  { %7768 = vmatprep.subr.bf16.mxu1 %v8649_v2 }
 0x47b   :  { %7282 = vmatmul.mubr.f32.vlgmr.msra.gmra.mrb[6].mxu0 %v3900_v49 }
 0x47c   :  { %7746 = vmatpush3.bf16.msra.mxu0 %v8655_v53  ;;  %7288 = vmatprep.mubr.f32.mxu0 %v8612_v27 }
 0x47f   :  { %7324 = vmatmul.mubr.f32.vlgmr.msra.gmra.mrb[8].mxu1 %v4414_v0 }
 0x480   :  { %7770 = vmatpush3.bf16.msra.mxu1 %v8649_v2  ;;  %7330 = vmatprep.mubr.f32.mxu1 %v8631_v45  ;;  %v8103_v45 = vld [vmem:[%s8888_s2 + $0x30] sm:$0xff] }
 0x483   :  { %7289 = vmatmul.mubr.f32.vlgmr.msra.gmra.mrb[6].mxu0 %v3900_v49 }
 0x487   :  { %7331 = vmatmul.mubr.f32.vlgmr.msra.gmra.mrb[8].mxu1 %v4414_v0 }
 0x4ed   :  { %v7206_v22 = vpop.f32.mrb[4].mxu1 }
 0x4ee   :  { %v3287_v29 = vpop.f32.mrb[5].mxu1 }
 0x521   :  { %v7248_v41 = vpop.f32.mrb[6].mxu1 }
 0x522   :  { %4843 = vrot.lane.b32.xlu1 %v7248_v41, %s8167_s11  ;;  %v3801_v12 = vpop.f32.mrb[7].mxu1 }
 0x523   :  { %4841 = vrot.lane.b32.xlu0 %v3801_v12, %s8167_s11 }
 0x556   :  { %v7290_v26 = vpop.f32.mrb[6].mxu0 }
 0x557   :  { %4851 = vrot.lane.b32.xlu1 %v7290_v26, %s8168_s12  ;;  %v4315_v27 = vpop.f32.mrb[7].mxu0  ;;  %v54_v26 = vld [vmem:[#allocation2 + $0x6] ss:$0 sm:$0xff] }
 0x558   :  { %4849 = vrot.lane.b32.xlu0 %v4315_v27, %s8168_s12 }
 0x55a   :  { %v7332_v42 = vpop.f32.mrb[8].mxu1 }
 0x55b   :  { %4859 = vrot.lane.b32.xlu1 %v7332_v42, %s8169_s13  ;;  %v4829_v36 = vpop.f32.mrb[9].mxu1 }
 0x55c   :  { %4857 = vrot.lane.b32.xlu0 %v4829_v36, %s8169_s13 }
 0x55f   :  { %4876 = vrot.lane.b32.xlu1 %v8101_v43, %s8170_s16 }
 0x560   :  { %4874 = vrot.lane.b32.xlu0 %v8102_v44, %s8170_s16  ;;  %v8105_v44 = vld [vmem:[%s8886_s0 + $0x8] sm:$0xff] }
 0x563   :  { %4880 = vrot.lane.b32.xlu1 %v8103_v45, %s8170_s16 }
 0x564   :  { %4878 = vrot.lane.b32.xlu0 %v8104_v46, %s8170_s16  ;;  %v8106_v46 = vld [vmem:[%s8886_s0] sm:$0xff] }
 0x594   :  { %v4844_v56 = vpop.permute.xlu1 %4843 }
 0x595   :  { %v4842_v61 = vpop.permute.xlu0 %4841  ;;  %v4864_v57 = vsel %vm597_vm1, %v7206_v22, %v4844_v56 }
 0x596   :  { %v4863_v37 = vsel %vm597_vm1, %v3287_v29, %v4842_v61 }
 0x5c9   :  { %v4852_v51 = vpop.permute.xlu1 %4851 }
 0x5ca   :  { %v4850_v55 = vpop.permute.xlu0 %4849  ;;  %v4866_v59 = vsel %vm2670_vm2, %v4864_v57, %v4852_v51 }
 0x5cb   :  { %v4865_v62 = vsel %vm2670_vm2, %v4863_v37, %v4850_v55 }
 0x5cd   :  { %v4860_v60 = vpop.permute.xlu1 %4859 }
 0x5ce   :  { %v4869_v63 = vsel %vm4867_vm3, %v4866_v59, %v4860_v60  ;;  %v4858_v2 = vpop.permute.xlu0 %4857 }
 0x5cf   :  { %v4890_v47 = vsel %vm56_vm0, %v4869_v63, 0  ;;  %v4868_v50 = vsel %vm4867_vm3, %v4865_v62, %v4858_v2 }
 0x5d0   :  { %v8730_v53 = vand.u32 4294901760, %v4890_v47  ;;  %v4887_v54 = vsel %vm56_vm0, %v4868_v50, 0 }
 0x5d1   :  { %v8733_v5 = vand.u32 4294901760, %v4887_v54  ;;  %v4877_v8 = vpop.permute.xlu1 %4876 }
 0x5d2   :  { %v4972_v1 = vsub.f32 %v4890_v47, %v8730_v53  ;;  %v4896_v7 = vand.u32 4294901760, %v4877_v8  ;;  %v4875_v4 = vpop.permute.xlu0 %4874 }
 0x5d3   :  { %v4962_v58 = vsub.f32 %v4887_v54, %v8733_v5  ;;  %v4893_v9 = vand.u32 4294901760, %v4875_v4  ;;  %v45_v54 = vld [vmem:[%s8888_s2 + $0x18] sm:$0xff] }
 0x5d4   :  { %v4973_v11 = vand.u32 4294901760, %v4972_v1  ;;  %v4990_v13 = vsub.f32 %v4877_v8, %v4896_v7 }
 0x5d5   :  { %v7771_v14 = vpack.c.bf16 %v4896_v7, %v4893_v9  ;;  %v4983_v16 = vsub.f32 %v4875_v4, %v4893_v9  ;;  %v4881_v6 = vpop.permute.xlu1 %4880  ;;  %v4963_v48 = vand.u32 4294901760, %v4962_v58  ;;  %v47_v7 = vld [vmem:[%s8888_s2 + $0x38] sm:$0xff] }
 0x5d6   :  { %v4991_v17 = vand.u32 4294901760, %v4990_v13  ;;  %v4902_v18 = vand.u32 4294901760, %v4881_v6  ;;  %v4879_v19 = vpop.permute.xlu0 %4878  ;;  %v4974_v49 = vsub.f32 %v4972_v1, %v4973_v11 }
 0x5d7   :  { %v4984_v20 = vand.u32 4294901760, %v4983_v16  ;;  %v4899_v10 = vand.u32 4294901760, %v4879_v19  ;;  %7772 = vmatprep.subr.bf16.mxu0 %v7771_v14  ;;  %v4964_v21 = vsub.f32 %v4962_v58, %v4963_v48  ;;  %v7787_v22 = vpack.c.bf16 %v4990_v13, %v4983_v16 }
 0x5d8   :  { %v4992_v23 = vsub.f32 %v4990_v13, %v4991_v17  ;;  %v5004_v25 = vsub.f32 %v4881_v6, %v4902_v18  ;;  %7774 = vmatpush3.bf16.msra.mxu0 %v7771_v14  ;;  %v4975_v15 = vand.u32 4294901760, %v4974_v49 }
 0x5d9   :  { %v4985_v28 = vsub.f32 %v4983_v16, %v4984_v20  ;;  %v7775_v30 = vpack.c.bf16 %v4902_v18, %v4899_v10  ;;  %v4997_v31 = vsub.f32 %v4879_v19, %v4899_v10  ;;  %v4965_v0 = vand.u32 4294901760, %v4964_v21 }
 0x5da   :  { %v5005_v32 = vand.u32 4294901760, %v5004_v25  ;;  %v4993_v33 = vand.u32 4294901760, %v4992_v23  ;;  %v7803_v41 = vpack.c.bf16 %v4991_v17, %v4984_v20 }
 0x5db   :  { %v4998_v24 = vand.u32 4294901760, %v4997_v31  ;;  %7776 = vmatprep.subr.bf16.mxu0 %v7775_v30  ;;  %7341 = vmatprep.mubr.f32.mxu0 %v4965_v0  ;;  %v4986_v34 = vand.u32 4294901760, %v4985_v28  ;;  %v7791_v29 = vpack.c.bf16 %v5004_v25, %v4997_v31 }
 0x5dc   :  { %v5006_v52 = vsub.f32 %v5004_v25, %v5005_v32  ;;  %7778 = vmatpush3.bf16.msra.mxu0 %v7775_v30 }
 0x5dd   :  { %v4999_v35 = vsub.f32 %v4997_v31, %v4998_v24  ;;  %v7779_v38 = vpack.c.bf16 %v4993_v33, %v4986_v34  ;;  %v7807_v12 = vpack.c.bf16 %v5005_v32, %v4998_v24 }
 0x5de   :  { %v5007_v3 = vand.u32 4294901760, %v5006_v52 }
 0x5df   :  { %7342 = vmatmul.mubr.f32.vlgmr.msra.gmra.mrb[8].mxu0 %v4975_v15  ;;  %7780 = vmatprep.subr.bf16.mxu0 %v7779_v38  ;;  %v5000_v39 = vand.u32 4294901760, %v4999_v35 }
 0x5e0   :  { %7782 = vmatpush3.bf16.msra.mxu0 %v7779_v38  ;;  %7352 = vmatprep.mubr.f32.mxu0 %v8733_v5 }
 0x5e1   :  { %v7783_v40 = vpack.c.bf16 %v5007_v3, %v5000_v39 }
 0x5e3   :  { %7784 = vmatprep.subr.bf16.mxu0 %v7783_v40 }
 0x5e4   :  { %7786 = vmatpush3.bf16.msra.mxu0 %v7783_v40 }
 0x5e5   :  { %7788 = vmatprep.subr.bf16.mxu0 %v7787_v22 }
 0x5e7   :  { %7353 = vmatmul.mubr.f32.vlgmr.msra.gmra.mrb[8].mxu0 %v8730_v53 }
 0x5e8   :  { %7790 = vmatpush3.bf16.msra.mxu0 %v7787_v22  ;;  %7363 = vmatprep.mubr.f32.mxu0 %v4962_v58  ;;  %v5469_v58 = vand.u32 4294901760, %v47_v7 }
 0x5e9   :  { %7792 = vmatprep.subr.bf16.mxu0 %v7791_v29 }
 0x5ea   :  { %v5571_v19 = vsub.f32 %v47_v7, %v5469_v58 }
 0x5ec   :  { %7794 = vmatpush3.bf16.msra.mxu0 %v7791_v29  ;;  %v5572_v23 = vand.u32 4294901760, %v5571_v19 }
 0x5ed   :  { %7796 = vmatprep.subr.bf16.mxu0 %v7771_v14 }
 0x5ee   :  { %v5573_v28 = vsub.f32 %v5571_v19, %v5572_v23 }
 0x5ef   :  { %7364 = vmatmul.mubr.f32.vlgmr.msra.gmra.mrb[8].mxu0 %v4972_v1  ;;  %v5463_v1 = vand.u32 4294901760, %v45_v54 }
 0x5f0   :  { %7798 = vmatpush3.bf16.msra.mxu0 %v7771_v14  ;;  %7374 = vmatprep.mubr.f32.mxu0 %v4963_v48  ;;  %v5574_v31 = vand.u32 4294901760, %v5573_v28 }
 0x5f1   :  { %7800 = vmatprep.subr.bf16.mxu0 %v7775_v30 }
 0x5f4   :  { %7802 = vmatpush3.bf16.msra.mxu0 %v7775_v30 }
 0x5f5   :  { %7804 = vmatprep.subr.bf16.mxu0 %v7803_v41 }
 0x5f7   :  { %7375 = vmatmul.mubr.f32.vlgmr.msra.gmra.mrb[8].mxu0 %v4973_v11 }
 0x5f8   :  { %7806 = vmatpush3.bf16.msra.mxu0 %v7803_v41  ;;  %7385 = vmatprep.mubr.f32.mxu0 %v8733_v5 }
 0x5f9   :  { %7808 = vmatprep.subr.bf16.mxu0 %v7807_v12 }
 0x5fc   :  { %7810 = vmatpush3.bf16.msra.mxu0 %v7807_v12 }
 0x5fd   :  { %7812 = vmatprep.subr.bf16.mxu0 %v7771_v14 }
 0x5ff   :  { %7386 = vmatmul.mubr.f32.vlgmr.msra.gmra.mrb[8].mxu0 %v8730_v53 }
 0x600   :  { %7814 = vmatpush3.bf16.msra.mxu0 %v7771_v14  ;;  %7396 = vmatprep.mubr.f32.mxu0 %v8733_v5  ;;  %v46_v5 = vld [vmem:[%s8888_s2 + $0x28] sm:$0xff]  ;;  %v5557_v14 = vsub.f32 %v45_v54, %v5463_v1 }
 0x601   :  { %7816 = vmatprep.subr.bf16.mxu0 %v7775_v30  ;;  %v5466_v4 = vand.u32 4294901760, %v46_v5 }
 0x602   :  { %v5558_v6 = vand.u32 4294901760, %v5557_v14 }
 0x603   :  { %v8777_v11 = vpack.c.bf16 %v5469_v58, %v5466_v4  ;;  %v5564_v18 = vsub.f32 %v46_v5, %v5466_v4 }
 0x604   :  { %7818 = vmatpush3.bf16.msra.mxu0 %v7775_v30  ;;  %v5559_v17 = vsub.f32 %v5557_v14, %v5558_v6 }
 0x605   :  { %v5565_v21 = vand.u32 4294901760, %v5564_v18  ;;  %v8790_v33 = vpack.c.bf16 %v5571_v19, %v5564_v18 }
 0x606   :  { %v5560_v10 = vand.u32 4294901760, %v5559_v17 }
 0x607   :  { %7397 = vmatmul.mubr.f32.vlgmr.msra.gmra.mrb[8].mxu0 %v8730_v53  ;;  %v44_v53 = vld [vmem:[%s8888_s2 + $0x8] sm:$0xff]  ;;  %v5566_v49 = vsub.f32 %v5564_v18, %v5565_v21  ;;  %v8794_v34 = vpack.c.bf16 %v5572_v23, %v5565_v21  ;;  %s8171_s2 = smov [#allocation5]  }
 0x608   :  { %v5460_v8 = vand.u32 4294901760, %v44_v53 }
 0x609   :  { %v5567_v30 = vand.u32 4294901760, %v5566_v49 }
 0x60a   :  { %v8775_v9 = vpack.c.bf16 %v5463_v1, %v5460_v8  ;;  %v5550_v13 = vsub.f32 %v44_v53, %v5460_v8 }
 0x60b   :  { %v7831_v0 = vpack.c.bf16 %v5574_v31, %v5567_v30 }
 0x60c   :  { %7820 = vmatprep.subr.bf16.mxu1 %v8775_v9  ;;  %v5551_v16 = vand.u32 4294901760, %v5550_v13  ;;  %v8788_v32 = vpack.c.bf16 %v5557_v14, %v5550_v13 }
 0x60d   :  { %7822 = vmatpush3.bf16.msra.mxu1 %v8775_v9 }
 0x60e   :  { %7824 = vmatprep.subr.bf16.mxu1 %v8777_v11  ;;  %v5552_v48 = vsub.f32 %v5550_v13, %v5551_v16  ;;  %v8792_v24 = vpack.c.bf16 %v5558_v6, %v5551_v16 }
 0x610   :  { %v5553_v20 = vand.u32 4294901760, %v5552_v48 }
 0x611   :  { %7826 = vmatpush3.bf16.msra.mxu1 %v8777_v11 }
 0x612   :  { %v8785_v25 = vpack.c.bf16 %v5560_v10, %v5553_v20 }
 0x614   :  { %7828 = vmatprep.subr.bf16.mxu1 %v8785_v25 }
 0x6da   :  { %v7398_v27 = vpop.f32.mrb[8].mxu0 }
 0x6db   :  { %v7917_v42 = vadd.f32 %v7398_v27, %v54_v26  ;;  %v5410_v36 = vpop.f32.mrb[9].mxu0 }
 0x6dc   :  { %v7918_v43 = vadd.f32 %v5410_v36, %v54_v26 }
 0x6dd   :  { %v5421_v45 = vadd.f32 %v8105_v44, %v7917_v42 }
 0x6de   :  { %v5420_v56 = vadd.f32 %v8106_v46, %v7918_v43  ;;  %v50_v46 = vld [vmem:[#allocation2 + $0x2] ss:$0 sm:$0xff] }
 0x6df   :  { %v5425_v61 = vsel %vm56_vm0, %v5421_v45, 0.0 }
 0x6e0   :  { %5426 = vadd.xlane.f32.xlu1 %v5425_v61  ;;  %v5422_v51 = vsel %vm56_vm0, %v5420_v56, 0.0 }
 0x6e1   :  { %5423 = vadd.xlane.f32.xlu0 %v5422_v51  ;;  %v51_v51 = vld [vmem:[#allocation2 + $0x3] ss:$0 sm:$0xff] }
 0x6f1   :  { %5993 = vrot.lane.b32.xlu1 %v44_v53, %s8163_s27 }
 0x6f5   :  { %5997 = vrot.lane.b32.xlu1 %v46_v5, %s8163_s27 }
 0x6f9   :  { %5999 = vrot.lane.b32.xlu1 %v47_v7, %s8163_s27 }
 0x76d   :  { %v5427_v55 = vpop.xlane.xlu1 %5426 }
 0x76e   :  { %v5430_v57 = vmul.f32 0.03125, %v5427_v55  ;;  %v5424_v37 = vpop.xlane.xlu0 %5423 }
 0x76f   :  { %v5429_v59 = vmul.f32 0.03125, %v5424_v37 }
 0x770   :  { %v8751_v60 = vsub.f32 %v5421_v45, %v5430_v57 }
 0x771   :  { %v8753_v62 = vsub.f32 %v5420_v56, %v5429_v59  ;;  %v5994_v40 = vpop.permute.xlu1 %5993 }
 0x772   :  { %v5434_v47 = vmul.f32 %v8751_v60, %v8751_v60  ;;  %v6008_v29 = vsel %vm6001_vm4, %v5994_v40, 0 }
 0x773   :  { %v5433_v63 = vmul.f32 %v8753_v62, %v8753_v62  ;;  %v6017_v12 = vand.u32 4294901760, %v6008_v29 }
 0x774   :  { %v5438_v50 = vsel %vm56_vm0, %v5434_v47, 0.0 }
 0x775   :  { %v5435_v2 = vsel %vm56_vm0, %v5433_v63, 0.0  ;;  %v8798_v27 = vsub.f32 %v6008_v29, %v6017_v12  ;;  %v5998_v43 = vpop.permute.xlu1 %5997 }
 0x776   :  { %5436 = vadd.xlane.f32.xlu0 %v5435_v2  ;;  %v6012_v44 = vsel %vm6001_vm4, %v5998_v43, 0 }
 0x777   :  { %v6023_v56 = vand.u32 4294901760, %v6012_v44  ;;  %v6108_v18 = vand.u32 4294901760, %v8798_v27 }
 0x779   :  { %v8808_v55 = vsub.f32 %v6012_v44, %v6023_v56  ;;  %v6000_v57 = vpop.permute.xlu1 %5999  ;;  %v6109_v20 = vsub.f32 %v8798_v27, %v6108_v18 }
 0x77a   :  { %5439 = vadd.xlane.f32.xlu0 %v5438_v50  ;;  %v6014_v59 = vsel %vm6001_vm4, %v6000_v57, 0 }
 0x77b   :  { %v6026_v2 = vand.u32 4294901760, %v6014_v59  ;;  %v6110_v49 = vand.u32 4294901760, %v6109_v20  ;;  %v52_v20 = vld [vmem:[#allocation2 + $0x4] ss:$0 sm:$0xff] }
 0x77d   :  { %v8814_v53 = vpack.c.bf16 %v6026_v2, %v6023_v56 }
 0x790   :  { %5995 = vrot.lane.b32.xlu0 %v45_v54, %s8163_s27  ;;  %v8816_v54 = vsub.f32 %v6014_v59, %v6026_v2  ;;  %s6583_s27 = sshll.u32 %s8171_s2, 4  ;;  %s6584_s27 = int_to_ptr.vmem [resolvable:$true] %s6583_s27 }
 0x791   :  { %s8129_s3 = scalar_lea.vmem %s6584_s27, 256  ;;  %p8134_p9 = scmp.lt.s32.totalorder %s6584_s27, %s6584_s27 }
 0x792   :  { %v7887_v31 = vpack.c.bf16 %v8816_v54, %v8808_v55  ;;  %p8130_p8 = scmp.ne.s32.totalorder %s6584_s27, %s8129_s3  ;;  %p8135_p10 = scmp.lt.s32.totalorder %s8129_s3, %s8129_s3 }
 0x794   :  { %p8136_p11 = por %p8135_p10, %p8134_p9 }
 0x796   :  { %p8137_p12 = pnand %p8136_p11, %p8130_p8 }
 0x803   :  { %v5437_v52 = vpop.xlane.xlu0 %5436 }
 0x804   :  { %v5441_v35 = vmul.f32 0.03125, %v5437_v52 }
 0x806   :  { %v5443_v15 = vadd.f32 1e-05, %v5441_v35 }
 0x807   :  { %v5440_v38 = vpop.xlane.xlu0 %5439 }
 0x808   :  { %8093 = vrsqrt.f32 %v5443_v15  ;;  %v5442_v3 = vmul.f32 0.03125, %v5440_v38 }
 0x80a   :  { %v5444_v39 = vadd.f32 1e-05, %v5442_v3 }
 0x80b   :  { %v5996_v22 = vpop.permute.xlu0 %5995 }
 0x80c   :  { %8095 = vrsqrt.f32 %v5444_v39  ;;  %v6010_v41 = vsel %vm6001_vm4, %v5996_v22, 0 }
 0x80d   :  { %v6020_v26 = vand.u32 4294901760, %v6010_v41 }
 0x80f   :  { %v8800_v42 = vpack.c.bf16 %v6020_v26, %v6017_v12  ;;  %v8802_v36 = vsub.f32 %v6010_v41, %v6020_v26 }
 0x811   :  { %7892 = vmatprep.subr.bf16.mxu0 %v8800_v42  ;;  %v6115_v19 = vand.u32 4294901760, %v8802_v36 }
 0x812   :  { %v8094_v45 = vpop.eup %8093  ;;  %7894 = vmatpush3.bf16.xpose.msra.mxu0 %v8800_v42 }
 0x813   :  { %v5447_v61 = vmul.f32 %v8094_v45, %v8753_v62  ;;  %7896 = vmatprep.subr.bf16.mxu0 %v8814_v53  ;;  %v6116_v10 = vsub.f32 %v8802_v36, %v6115_v19 }
 0x815   :  { %v5449_v37 = vmul.f32 %v5447_v61, %v50_v46  ;;  %v6117_v28 = vand.u32 4294901760, %v6116_v10 }
 0x816   :  { %v8096_v63 = vpop.eup %8095 }
 0x817   :  { %v5448_v47 = vmul.f32 %v8096_v63, %v8751_v60  ;;  %v8812_v50 = vadd.f32 %v5449_v37, %v51_v51  ;;  %v7875_v30 = vpack.c.bf16 %v6117_v28, %v6110_v49 }
 0x819   :  { %v5450_v62 = vmul.f32 %v5448_v47, %v50_v46  ;;  %v5454_v5 = vsel %vm56_vm0, %v8812_v50, 0 }
 0x81a   :  { %v5528_v8 = vand.u32 4294901760, %v5454_v5  ;;  %7898 = vmatpush3.bf16.xpose.msra.mxu0 %v8814_v53 }
 0x81b   :  { %v8821_v1 = vadd.f32 %v5450_v62, %v51_v51  ;;  %v7883_v51 = vpack.c.bf16 %v8802_v36, %v8798_v27  ;;  %v55_v27 = vld [vmem:[#allocation2 + $0x7] ss:$0 sm:$0xff] }
 0x81c   :  { %v5529_v7 = vsub.f32 %v5454_v5, %v5528_v8 }
 0x81d   :  { %v5457_v60 = vsel %vm56_vm0, %v8821_v1, 0 }
 0x81e   :  { %v5530_v4 = vand.u32 4294901760, %v5529_v7  ;;  %v5538_v58 = vand.u32 4294901760, %v5457_v60 }
 0x820   :  { %v5531_v13 = vsub.f32 %v5529_v7, %v5530_v4  ;;  %v5539_v14 = vsub.f32 %v5457_v60, %v5538_v58 }
 0x822   :  { %v5532_v16 = vand.u32 4294901760, %v5531_v13  ;;  %v5540_v6 = vand.u32 4294901760, %v5539_v14 }
 0x824   :  { %7407 = vmatprep.mubr.f32.mxu1 %v5532_v16  ;;  %v5541_v48 = vsub.f32 %v5539_v14, %v5540_v6 }
 0x826   :  { %v5542_v17 = vand.u32 4294901760, %v5541_v48 }
 0x828   :  { %7408 = vmatmul.mubr.f32.vlgmr.msra.gmra.mrb[10].mxu1 %v5542_v17 }
 0x829   :  { %7830 = vmatpush3.bf16.msra.mxu1 %v8785_v25  ;;  %7418 = vmatprep.mubr.f32.mxu1 %v5528_v8  ;;  %v7899_v25 = vpack.c.bf16 %v6115_v19, %v6108_v18 }
 0x82a   :  { %7832 = vmatprep.subr.bf16.mxu1 %v7831_v0 }
 0x82b   :  { %7900 = vmatprep.subr.bf16.mxu0 %v7899_v25 }
 0x82d   :  { %7834 = vmatpush3.bf16.msra.mxu1 %v7831_v0 }
 0x82e   :  { %7836 = vmatprep.subr.bf16.mxu1 %v8788_v32 }
 0x830   :  { %7419 = vmatmul.mubr.f32.vlgmr.msra.gmra.mrb[10].mxu1 %v5538_v58 }
 0x831   :  { %7838 = vmatpush3.bf16.msra.mxu1 %v8788_v32  ;;  %7429 = vmatprep.mubr.f32.mxu1 %v5529_v7 }
 0x832   :  { %7840 = vmatprep.subr.bf16.mxu1 %v8790_v33 }
 0x835   :  { %7842 = vmatpush3.bf16.msra.mxu1 %v8790_v33 }
 0x836   :  { %7844 = vmatprep.subr.bf16.mxu1 %v8775_v9 }
 0x838   :  { %7430 = vmatmul.mubr.f32.vlgmr.msra.gmra.mrb[10].mxu1 %v5539_v14 }
 0x839   :  { %7846 = vmatpush3.bf16.msra.mxu1 %v8775_v9  ;;  %7440 = vmatprep.mubr.f32.mxu1 %v5530_v4 }
 0x83a   :  { %7848 = vmatprep.subr.bf16.mxu1 %v8777_v11 }
 0x83d   :  { %7850 = vmatpush3.bf16.msra.mxu1 %v8777_v11 }
 0x83e   :  { %7852 = vmatprep.subr.bf16.mxu1 %v8792_v24 }
 0x840   :  { %7441 = vmatmul.mubr.f32.vlgmr.msra.gmra.mrb[10].mxu1 %v5540_v6 }
 0x841   :  { %7854 = vmatpush3.bf16.msra.mxu1 %v8792_v24  ;;  %7451 = vmatprep.mubr.f32.mxu1 %v5528_v8 }
 0x842   :  { %7856 = vmatprep.subr.bf16.mxu1 %v8794_v34 }
 0x845   :  { %7858 = vmatpush3.bf16.msra.mxu1 %v8794_v34  ;;  %v49_v34 = vld [vmem:[#allocation2 + $0x1] ss:$0 sm:$0xff] }
 0x846   :  { %7860 = vmatprep.subr.bf16.mxu1 %v8775_v9 }
 0x848   :  { %7452 = vmatmul.mubr.f32.vlgmr.msra.gmra.mrb[10].mxu1 %v5538_v58 }
 0x849   :  { %7862 = vmatpush3.bf16.msra.mxu1 %v8775_v9  ;;  %7462 = vmatprep.mubr.f32.mxu1 %v5528_v8  ;;  %v6122_v9 = vand.u32 4294901760, %v8808_v55 }
 0x84a   :  { %7864 = vmatprep.subr.bf16.mxu1 %v8777_v11 }
 0x84b   :  { %v6123_v21 = vsub.f32 %v8808_v55, %v6122_v9 }
 0x84d   :  { %7866 = vmatpush3.bf16.msra.mxu1 %v8777_v11  ;;  %v6129_v11 = vand.u32 4294901760, %v8816_v54  ;;  %v6124_v32 = vand.u32 4294901760, %v6123_v21 }
 0x84e   :  { %7868 = vmatprep.subr.bf16.mxu1 %v8800_v42 }
 0x84f   :  { %v6130_v23 = vsub.f32 %v8816_v54, %v6129_v11  ;;  %v7903_v0 = vpack.c.bf16 %v6129_v11, %v6122_v9  ;;  %v53_v11 = vld [vmem:[#allocation2 + $0x5] ss:$0 sm:$0xff] }
 0x850   :  { %7463 = vmatmul.mubr.f32.vlgmr.msra.gmra.mrb[10].mxu1 %v5538_v58 }
 0x851   :  { %v6131_v33 = vand.u32 4294901760, %v6130_v23 }
 0x853   :  { %v7879_v24 = vpack.c.bf16 %v6131_v33, %v6124_v32 }
 0x856   :  { %7870 = vmatpush3.bf16.xpose.msra.mxu1 %v8800_v42 }
 0x857   :  { %7872 = vmatprep.subr.bf16.mxu1 %v8814_v53 }
 0x85e   :  { %7874 = vmatpush3.bf16.xpose.msra.mxu1 %v8814_v53 }
 0x85f   :  { %7876 = vmatprep.subr.bf16.mxu1 %v7875_v30 }
 0x923   :  { %v7464_v52 = vpop.f32.mrb[10].mxu1 }
 0x924   :  { %v7919_v35 = vadd.f32 %v7464_v52, %v49_v34  ;;  %v5977_v15 = vpop.f32.mrb[11].mxu1 }
 0x925   :  { %v7920_v38 = vadd.f32 %v5977_v15, %v49_v34 }
 0x926   :  { %v5988_v3 = vmax.f32 %v7919_v35, 0.0 }
 0x927   :  { %v5987_v39 = vmax.f32 %v7920_v38, 0.0 }
 0x928   :  { %v6006_v40 = vsel %vm6001_vm4, %v5988_v3, 0 }
 0x929   :  { %v6095_v22 = vand.u32 4294901760, %v6006_v40  ;;  %v6003_v29 = vsel %vm6001_vm4, %v5987_v39, 0 }
 0x92a   :  { %v6085_v41 = vand.u32 4294901760, %v6003_v29 }
 0x92b   :  { %v6096_v12 = vsub.f32 %v6006_v40, %v6095_v22 }
 0x92c   :  { %v6086_v26 = vsub.f32 %v6003_v29, %v6085_v41 }
 0x92d   :  { %v6097_v43 = vand.u32 4294901760, %v6096_v12 }
 0x92e   :  { %v6087_v44 = vand.u32 4294901760, %v6086_v26 }
 0x92f   :  { %v6098_v45 = vsub.f32 %v6096_v12, %v6097_v43 }
 0x930   :  { %7506 = vmatprep.mubr.f32.mxu0 %v6087_v44  ;;  %v6088_v46 = vsub.f32 %v6086_v26, %v6087_v44 }
 0x931   :  { %7507 = vmatmul.mubr.f32.vlgmr.msra.gmra.mrb[10].mxu0 %v6097_v43  ;;  %v6099_v61 = vand.u32 4294901760, %v6098_v45 }
 0x932   :  { %7902 = vmatpush3.bf16.xpose.msra.mxu0 %v7899_v25  ;;  %7517 = vmatprep.mubr.f32.mxu0 %v6085_v41  ;;  %v6089_v56 = vand.u32 4294901760, %v6088_v46 }
 0x933   :  { %7904 = vmatprep.subr.bf16.mxu0 %v7903_v0 }
 0x934   :  { %7473 = vmatprep.mubr.f32.mxu1 %v6089_v56 }
 0x935   :  { %7474 = vmatmul.mubr.f32.vlgmr.msra.gmra.mrb[12].mxu1 %v6099_v61 }
 0x936   :  { %7878 = vmatpush3.bf16.xpose.msra.mxu1 %v7875_v30  ;;  %7484 = vmatprep.mubr.f32.mxu1 %v6085_v41 }
 0x937   :  { %7880 = vmatprep.subr.bf16.mxu1 %v7879_v24 }
 0x93a   :  { %7906 = vmatpush3.bf16.xpose.msra.mxu0 %v7903_v0 }
 0x93b   :  { %7908 = vmatprep.subr.bf16.mxu0 %v8800_v42 }
 0x93e   :  { %7882 = vmatpush3.bf16.xpose.msra.mxu1 %v7879_v24 }
 0x93f   :  { %7884 = vmatprep.subr.bf16.mxu1 %v7883_v51 }
 0x941   :  { %7518 = vmatmul.mubr.f32.vlgmr.msra.gmra.mrb[10].mxu0 %v6095_v22 }
 0x942   :  { %7910 = vmatpush3.bf16.xpose.msra.mxu0 %v8800_v42  ;;  %7528 = vmatprep.mubr.f32.mxu0 %v6085_v41 }
 0x943   :  { %7912 = vmatprep.subr.bf16.mxu0 %v8814_v53 }
 0x945   :  { %7485 = vmatmul.mubr.f32.vlgmr.msra.gmra.mrb[12].mxu1 %v6095_v22 }
 0x946   :  { %7886 = vmatpush3.bf16.xpose.msra.mxu1 %v7883_v51  ;;  %7495 = vmatprep.mubr.f32.mxu1 %v6086_v26 }
 0x947   :  { %7888 = vmatprep.subr.bf16.mxu1 %v7887_v31 }
 0x94a   :  { %7914 = vmatpush3.bf16.xpose.msra.mxu0 %v8814_v53 }
 0x94e   :  { %7890 = vmatpush3.bf16.xpose.msra.mxu1 %v7887_v31 }
 0x951   :  { %7529 = vmatmul.mubr.f32.vlgmr.msra.gmra.mrb[10].mxu0 %v6095_v22 }
 0x955   :  { %7496 = vmatmul.mubr.f32.vlgmr.msra.gmra.mrb[12].mxu1 %v6096_v12 }
 0xa24   :  { %v7530_v55 = vpop.f32.mrb[10].mxu0 }
 0xa25   :  { %v6534_v57 = vpop.f32.mrb[11].mxu0 }
 0xa28   :  { %v7497_v36 = vpop.f32.mrb[12].mxu1 }
 0xa29   :  { %v7921_v37 = vadd.f32 %v7497_v36, %v55_v27  ;;  %v6278_v59 = vpop.f32.mrb[13].mxu1 }
 0xa2a   :  { %v7923_v63 = vadd.f32 %v6278_v59, %v55_v27 }
 0xa2b   :  { %v7922_v42 = vadd.f32 %v7921_v37, %v7530_v55 }
 0xa2c   :  { %v7924_v2 = vadd.f32 %v7923_v63, %v6534_v57 }
 0xa2d   :  { %v6545_v47 = vadd.f32 %v7922_v42, %v8821_v1 }
 0xa2e   :  { %v6544_v54 = vadd.f32 %v7924_v2, %v8812_v50 }
 0xa2f   :  { %v6549_v62 = vsel %vm56_vm0, %v6545_v47, 0.0 }
 0xa30   :  { %6550 = vadd.xlane.f32.xlu1 %v6549_v62  ;;  %v6546_v53 = vsel %vm56_vm0, %v6544_v54, 0.0 }
 0xa31   :  { %6547 = vadd.xlane.f32.xlu0 %v6546_v53 }
 0xabd   :  { %v6551_v5 = vpop.xlane.xlu1 %6550 }
 0xabe   :  { %v6553_v8 = vmul.f32 0.03125, %v6551_v5  ;;  %v6548_v7 = vpop.xlane.xlu0 %6547 }
 0xabf   :  { %v6552_v60 = vmul.f32 0.03125, %v6548_v7 }
 0xac0   :  { %v6555_v4 = vsub.f32 %v6545_v47, %v6553_v8 }
 0xac1   :  { %v6554_v58 = vsub.f32 %v6544_v54, %v6552_v60 }
 0xac2   :  { %v6557_v16 = vmul.f32 %v6555_v4, %v6555_v4 }
 0xac3   :  { %v6556_v13 = vmul.f32 %v6554_v58, %v6554_v58 }
 0xac4   :  { %v6561_v1 = vsel %vm56_vm0, %v6557_v16, 0.0 }
 0xac5   :  { %v6558_v14 = vsel %vm56_vm0, %v6556_v13, 0.0 }
 0xac6   :  { %6559 = vadd.xlane.f32.xlu0 %v6558_v14 }
 0xaca   :  { %6562 = vadd.xlane.f32.xlu0 %v6561_v1 }
 0xb53   :  { %v6560_v50 = vpop.xlane.xlu0 %6559 }
 0xb54   :  { %v6564_v6 = vmul.f32 0.03125, %v6560_v50 }
 0xb56   :  { %v6566_v48 = vadd.f32 1e-05, %v6564_v6 }
 0xb57   :  { %v6563_v17 = vpop.xlane.xlu0 %6562 }
 0xb58   :  { %8097 = vrsqrt.f32 %v6566_v48  ;;  %v6565_v18 = vmul.f32 0.03125, %v6563_v17 }
 0xb5a   :  { %v6567_v19 = vadd.f32 1e-05, %v6565_v18 }
 0xb5c   :  { %8099 = vrsqrt.f32 %v6567_v19 }
 0xb62   :  { %v8098_v9 = vpop.eup %8097 }
 0xb63   :  { %v6570_v10 = vmul.f32 %v8098_v9, %v6554_v58 }
 0xb65   :  { %v6572_v21 = vmul.f32 %v6570_v10, %v52_v20 }
 0xb66   :  { %v8100_v23 = vpop.eup %8099 }
 0xb67   :  { %v6571_v25 = vmul.f32 %v8100_v23, %v6555_v4  ;;  %v6574_v49 = vadd.f32 %v6572_v21, %v53_v11 }
 0xb69   :  { %v6573_v28 = vmul.f32 %v6571_v25, %v52_v20  ;;  %6576 = vst.msk [vmem:[#allocation5] sm:$0xff] %vm56_vm0, %v6574_v49 }
 0xb6b   :  { %v6575_v30 = vadd.f32 %v6573_v28, %v53_v11 }
 0xb6d   :  { %6577 = vst.msk [vmem:[#allocation5 + $0x8] sm:$0xff] %vm56_vm0, %v6575_v30 }
 0xb6e   :  { %8140 = shalt.err (!%p8137_p12)
}
 0xb6f   :  { %s8141_s10 = scalar_lea.hbm %s8890_s4, 256 }
 0xb70   :  { %p8142_p13 = scmp.ne.s32.totalorder %s8890_s4, %s8141_s10  ;;  %p8145_p0 = scmp.lt.u32.totalorder %s8141_s10, %s8890_s4 }
 0xb72   :  { %p8147_p1 = pnand %p8145_p0, %p8142_p13 }
 0xb74   :  { %8150 = shalt.err (!%p8147_p1)
}
 0xb75   :  { %s8172_s16 = smov 128  }
 0xb76   :  { %6589 = dma.vmem_to_hbm [thread:$0]  %s6584_s27, 256, %s8890_s4, [#allocation4], %s8172_s16, %s8172_s16, %s8167_s11  }
 0xb77   :  { %8153 = dma.done.wait [#allocation4], 256  }
 0xb78   :  { %8154 = vsyncadd [#allocation4], 4294967040 }
 0xb79   :  { %6593 = vsyncpa [#allocation3], 1 }
 0xb7a   :  { %6594 = vsyncpa [#allocation4], 1 }

</bundles_post_ra>
